<compile_context>
chip_gen: v5e
topology: v5e:2x2
jax: 0.10.0
libtpu: 0.0.40
codegen_flags: <defaults>
</compile_context>

<pallas_src>
import functools

import jax
import jax.numpy as jnp
from jax.experimental import pallas as pl
from jax.experimental.pallas import tpu as pltpu


def _round_up(x, m):
    return ((x + m - 1) // m) * m


def _pad2(a, rows, cols):
    r, c = a.shape
    if r == rows and c == cols:
        return a
    return jnp.pad(a, ((0, rows - r), (0, cols - c)))


# ----------------------------------------------------------------------------
# Pallas kernels: out = maybe_relu( patches @ W_scaled + bias [+ residual] )
#   patches / W are bf16; accumulation is f32.
# ----------------------------------------------------------------------------
def _conv_bn_kernel_1k(*refs, apply_relu, has_residual):
    """Single K-tile: fuse matmul + bias + residual + ReLU, no scratch round-trip."""
    if has_residual:
        p_ref, w_ref, b_ref, r_ref, o_ref = refs
    else:
        p_ref, w_ref, b_ref, o_ref = refs
        r_ref = None
    out = jnp.dot(p_ref[...], w_ref[...], preferred_element_type=jnp.float32)
    out = out + b_ref[...]
    if has_residual:
        out = out + r_ref[...]
    if apply_relu:
        out = jnp.maximum(out, 0.0)
    o_ref[...] = out.astype(o_ref.dtype)


def _conv_bn_kernel_nk(*refs, apply_relu, has_residual):
    """Multi K-tile: f32 VMEM accumulator across the reduction (last) grid axis."""
    if has_residual:
        p_ref, w_ref, b_ref, r_ref, o_ref, acc_ref = refs
    else:
        p_ref, w_ref, b_ref, o_ref, acc_ref = refs
        r_ref = None

    k = pl.program_id(2)

    @pl.when(k == 0)
    def _():
        acc_ref[...] = jnp.zeros_like(acc_ref)

    acc_ref[...] += jnp.dot(p_ref[...], w_ref[...],
                            preferred_element_type=jnp.float32)

    @pl.when(k == pl.num_programs(2) - 1)
    def _():
        out = acc_ref[...] + b_ref[...]
        if has_residual:
            out = out + r_ref[...]
        if apply_relu:
            out = jnp.maximum(out, 0.0)
        o_ref[...] = out.astype(o_ref.dtype)


def conv_bn_pallas(patches, w, bias, residual, apply_relu, out_dtype=jnp.float32):
    """Fused conv(im2col matmul, bf16 operands) + folded-BN bias + optional residual/ReLU."""
    R, K = patches.shape
    Cout = w.shape[1]
    has_residual = residual is not None

    # --- tile selection: lane-dense output, MXU-friendly, VMEM-safe on v5e/v6e/v7x ---
    Np = _round_up(Cout, 128)
    TN = 256 if Np % 256 == 0 else 128
    if K <= 512:                                  # single K tile (full-dim block allowed)
        Kp, TK = K, K
    else:
        Kp = _round_up(K, 128)
        TK = 512 if Kp % 512 == 0 else (256 if Kp % 256 == 0 else 128)
    Rp = _round_up(R, 8)
    TR_target = 512
    if Rp <= TR_target:
        TR = Rp
    else:
        TR = TR_target
        Rp = _round_up(R, TR)

    patches_p = _pad2(patches.astype(jnp.bfloat16), Rp, Kp)
    w_p = _pad2(w.astype(jnp.bfloat16), Kp, Np)
    bias_p = _pad2(bias.astype(jnp.float32), 1, Np)

    out_bytes = Rp * Np * jnp.dtype(out_dtype).itemsize
    bytes_accessed = (patches_p.size * 2 + w_p.size * 2 + bias_p.size * 4
                      + (Rp * Np * 4 if has_residual else 0) + out_bytes)
    cost = pl.CostEstimate(flops=2 * Rp * Kp * Np, transcendentals=0,
                           bytes_accessed=bytes_accessed)

    nk = Kp // TK
    inputs = [patches_p, w_p, bias_p]
    if nk == 1:
        in_specs = [
            pl.BlockSpec((TR, Kp), lambda i, j: (i, 0)),   # patches (bf16)
            pl.BlockSpec((Kp, TN), lambda i, j: (0, j)),   # BN-scaled weight (bf16)
            pl.BlockSpec((1, TN), lambda i, j: (0, j)),    # folded BN bias (f32)
        ]
        if has_residual:
            inputs.append(_pad2(residual.astype(jnp.float32), Rp, Np))
            in_specs.append(pl.BlockSpec((TR, TN), lambda i, j: (i, j)))
        kern = functools.partial(_conv_bn_kernel_1k, apply_relu=apply_relu,
                                 has_residual=has_residual)
        grid = (Rp // TR, Np // TN)
        out_specs = pl.BlockSpec((TR, TN), lambda i, j: (i, j))
        scratch = []
        dim_sem = ("parallel", "parallel")
    else:
        in_specs = [
            pl.BlockSpec((TR, TK), lambda i, j, k: (i, k)),
            pl.BlockSpec((TK, TN), lambda i, j, k: (k, j)),
            pl.BlockSpec((1, TN), lambda i, j, k: (0, j)),
        ]
        if has_residual:
            inputs.append(_pad2(residual.astype(jnp.float32), Rp, Np))
            in_specs.append(pl.BlockSpec((TR, TN), lambda i, j, k: (i, j)))
        kern = functools.partial(_conv_bn_kernel_nk, apply_relu=apply_relu,
                                 has_residual=has_residual)
        grid = (Rp // TR, Np // TN, nk)
        out_specs = pl.BlockSpec((TR, TN), lambda i, j, k: (i, j))
        scratch = [pltpu.VMEM((TR, TN), jnp.float32)]
        dim_sem = ("parallel", "parallel", "arbitrary")

    out = pl.pallas_call(
        kern,
        out_shape=jax.ShapeDtypeStruct((Rp, Np), out_dtype),
        grid_spec=pltpu.PrefetchScalarGridSpec(
            num_scalar_prefetch=0,
            grid=grid,
            in_specs=in_specs,
            out_specs=out_specs,
            scratch_shapes=scratch,
        ),
        compiler_params=pltpu.CompilerParams(
            dimension_semantics=dim_sem,
            vmem_limit_bytes=48 * 1024 * 1024,
        ),
        cost_estimate=cost,
    )(*inputs)
    return out[:R, :Cout]


# ----------------------------------------------------------------------------
# Plain-JAX glue (layout, im2col-with-fused-upsample, BN folding)
# ----------------------------------------------------------------------------
def _nearest_tap_index(out_size, scale, tap, padding):
    u = jnp.arange(out_size, dtype=jnp.int32) + (tap - padding)
    src = jnp.clip(u, 0, out_size - 1) // scale
    if tap == padding:
        return src, None                    # center tap: always in-bounds, skip mask
    valid = (u >= 0) & (u < out_size)
    return src, valid


def im2col_3d(x_ndhwc, ksize, padding, scale=1):
    """bf16 im2col patches of nearest-upsample(x, scale) for a stride-1 conv.

    The upsample is folded into the per-tap gather indices (the upsampled tensor is
    never materialized); out-of-bounds (zero-padding) taps are masked to zero.
    """
    x = x_ndhwc.astype(jnp.bfloat16)
    N, D, H, W, C = x.shape
    Do, Ho, Wo = D * scale, H * scale, W * scale
    cols = []
    for a in range(ksize):
        di, dm = _nearest_tap_index(Do, scale, a, padding)
        for b in range(ksize):
            hi, hm = _nearest_tap_index(Ho, scale, b, padding)
            for c in range(ksize):
                wi, wm = _nearest_tap_index(Wo, scale, c, padding)
                g = x[:, di][:, :, hi][:, :, :, wi]                  # (N,Do,Ho,Wo,C)
                parts = []
                if dm is not None:
                    parts.append(dm[:, None, None])
                if hm is not None:
                    parts.append(hm[None, :, None])
                if wm is not None:
                    parts.append(wm[None, None, :])
                if parts:
                    m = parts[0]
                    for p in parts[1:]:
                        m = m & p
                    m = jnp.broadcast_to(m, (Do, Ho, Wo))
                    g = g * m[None, :, :, :, None].astype(x.dtype)
                cols.append(g)
    patches = jnp.concatenate(cols, axis=-1)                         # tap-major, ch-minor
    return patches.reshape(N * Do * Ho * Wo, ksize ** 3 * C)


def upsample_nearest(x_ndhwc, s):
    x = jnp.repeat(x_ndhwc, s, axis=1)
    x = jnp.repeat(x, s, axis=2)
    x = jnp.repeat(x, s, axis=3)
    return x


def fold_conv_bn(conv_w_oidhw, bn, eps=1e-5):
    """(Cout,Cin,kd,kh,kw) + BN stats -> bf16 (K,Cout) scaled weight, f32 (1,Cout) bias."""
    scale = bn["gamma"] / jnp.sqrt(bn["var"] + eps)
    bias = bn["beta"] - bn["mean"] * scale
    cout = conv_w_oidhw.shape[0]
    w = jnp.transpose(conv_w_oidhw, (2, 3, 4, 1, 0)).reshape(-1, cout)   # (K, Cout)
    w = (w * scale[None, :]).astype(jnp.bfloat16)
    return w, bias.reshape(1, -1).astype(jnp.float32)


# ----------------------------------------------------------------------------
# BasicBlockDec forward (Pallas)
# ----------------------------------------------------------------------------
def basic_block_dec_forward(x_ncdhw, params, stride):
    x = jnp.transpose(x_ncdhw, (0, 2, 3, 4, 1)).astype(jnp.float32)      # NDHWC
    N, D, H, W, Cin = x.shape
    planes = Cin // stride

    # ---- h = relu(bn2(conv2(x))) ----  (emitted directly in bf16: it is only ever a
    # bf16 matmul operand downstream; halves its HBM write + read)
    pA = im2col_3d(x, 3, 1, scale=1)
    wA, bA = fold_conv_bn(params["conv2_w"], params["bn2"])
    h = conv_bn_pallas(pA, wA, bA, None, apply_relu=True, out_dtype=jnp.bfloat16)
    h = h.reshape(N, D, H, W, Cin)

    if stride == 1:
        Do, Ho, Wo = D, H, W
        sc_flat = x.reshape(N * D * H * W, Cin)          # identity shortcut (f32 residual)
        pC = im2col_3d(h, 3, 1, scale=1)
    else:
        Do, Ho, Wo = D * stride, H * stride, W * stride
        # Shortcut: 1x1x1 conv + BN commute with nearest upsample -> matmul at the
        # original (stride^3 smaller) resolution, replicate afterwards.
        wS, bS = fold_conv_bn(params["sc_conv_w"], params["sc_bn"])
        sc_small = conv_bn_pallas(x.reshape(N * D * H * W, Cin), wS, bS, None,
                                  apply_relu=False)
        sc = upsample_nearest(sc_small.reshape(N, D, H, W, planes), stride)
        sc_flat = sc.reshape(N * Do * Ho * Wo, planes)
        # conv1 path (ResizeConv3d): nearest upsample folded into the im2col gather.
        pC = im2col_3d(h, 3, 1, scale=stride)

    # ---- out = relu(bn1(conv1(h1)) + shortcut) ----
    wC, bC = fold_conv_bn(params["conv1_w"], params["bn1"])
    out_flat = conv_bn_pallas(pC, wC, bC, sc_flat, apply_relu=True)
    out = out_flat.reshape(N, Do, Ho, Wo, planes)
    return jnp.transpose(out, (0, 4, 1, 2, 3))                           # back to NCDHW


# ----------------------------------------------------------------------------
# Pure-JAX reference mirroring the module order-of-ops and the kernel's numerics
# (bf16 operands, f32 accumulation, eval-mode BN folded) for the correctness check.
# ----------------------------------------------------------------------------
def _ref_conv_bn(x_ndhwc, conv_w, bn, padding, relu, eps=1e-5):
    scale = bn["gamma"] / jnp.sqrt(bn["var"] + eps)
    bias = bn["beta"] - bn["mean"] * scale
    w = (jnp.transpose(conv_w, (2, 3, 4, 1, 0)) * scale).astype(jnp.bfloat16)  # DHWIO
    y = jax.lax.conv_general_dilated(
        x_ndhwc.astype(jnp.bfloat16), w, window_strides=(1, 1, 1),
        padding=[(padding, padding)] * 3,
        dimension_numbers=("NDHWC", "DHWIO", "NDHWC"),
        preferred_element_type=jnp.float32)
    y = y + bias.reshape(1, 1, 1, 1, -1)
    return jnp.maximum(y, 0.0) if relu else y


def ref_forward(x_ncdhw, params, stride):
    x = jnp.transpose(x_ncdhw, (0, 2, 3, 4, 1)).astype(jnp.float32)
    h = _ref_conv_bn(x, params["conv2_w"], params["bn2"], 1, relu=True)
    if stride == 1:
        sc, h1 = x, h
    else:
        sc = _ref_conv_bn(upsample_nearest(x, stride), params["sc_conv_w"],
                          params["sc_bn"], 0, relu=False)
        h1 = upsample_nearest(h, stride)
    out = _ref_conv_bn(h1, params["conv1_w"], params["bn1"], 1, relu=False) + sc
    out = jnp.maximum(out, 0.0)
    return jnp.transpose(out, (0, 4, 1, 2, 3))


# ----------------------------------------------------------------------------
# Deterministic parameter init (synthetic; shapes from BasicBlockDec.__init__)
# ----------------------------------------------------------------------------
def _bn_init(key, c):
    k1, k2, k3, k4 = jax.random.split(key, 4)
    return dict(
        gamma=1.0 + 0.1 * jax.random.normal(k1, (c,), jnp.float32),
        beta=0.1 * jax.random.normal(k2, (c,), jnp.float32),
        mean=0.1 * jax.random.normal(k3, (c,), jnp.float32),
        var=jax.random.uniform(k4, (c,), jnp.float32, minval=0.5, maxval=1.5),
    )


def init_params(key, in_planes, stride):
    planes = in_planes // stride
    ks = jax.random.split(key, 6)

    def w_init(k, shape):
        fan_in = shape[1] * shape[2] * shape[3] * shape[4]
        return jax.random.normal(k, shape, jnp.float32) / jnp.sqrt(fan_in)

    p = {
        "conv2_w": w_init(ks[0], (in_planes, in_planes, 3, 3, 3)),
        "bn2": _bn_init(ks[1], in_planes),
        "conv1_w": w_init(ks[2], (planes, in_planes, 3, 3, 3)),
        "bn1": _bn_init(ks[3], planes),
    }
    if stride != 1:
        p["sc_conv_w"] = w_init(ks[4], (planes, in_planes, 1, 1, 1))
        p["sc_bn"] = _bn_init(ks[5], planes)
    return p


# ----------------------------------------------------------------------------
if __name__ == "__main__":
    key = jax.random.PRNGKey(0)
    kx, kp1, kp2 = jax.random.split(key, 3)

    in_planes = 4
    x = jax.random.normal(kx, (2, in_planes, 8, 8, 8), jnp.float32)   # NCDHW

    fwd = jax.jit(basic_block_dec_forward, static_argnums=2)
    ref = jax.jit(ref_forward, static_argnums=2)

    # stride = 1 (identity shortcut) and stride = 2 (ResizeConv3d path)
    for stride, kp in ((1, kp1), (2, kp2)):
        params = init_params(kp, in_planes, stride)
        out = jax.block_until_ready(fwd(x, params, stride))
        expect = jax.block_until_ready(ref(x, params, stride))
        assert out.shape == expect.shape, (out.shape, expect.shape)
        err = float(jnp.max(jnp.abs(out - expect)))
        # bf16-operand / f32-accumulate numerics: tolerance covers summation-order /
        # one-ulp bf16 differences between the Pallas path and the lax.conv reference.
        assert jnp.allclose(out, expect, atol=1e-2, rtol=1e-2), (
            f"mismatch (stride={stride}): max abs err = {err}")

    print("KERNEL_OK")
</pallas_src>

<mosaic_0001>
module attributes {stable_mosaic.version = 11 : i64} {
  func.func @_conv_bn_kernel_1k(%arg0: i32, %arg1: i32, %arg2: memref<512x108xbf16, #tpu.memory_space<vmem>>, %arg3: memref<108x128xbf16, #tpu.memory_space<vmem>>, %arg4: memref<1x128xf32, #tpu.memory_space<vmem>>, %arg5: memref<512x128xbf16, #tpu.memory_space<vmem>>) attributes {dimension_semantics = [#tpu.dimension_semantics<parallel>, #tpu.dimension_semantics<parallel>], iteration_bounds = array<i64: 2, 1>, scalar_prefetch = 0 : i64, scratch_operands = 0 : i64, tpu.core_type = #tpu.core_type<tc>, window_params = [{transform_indices = @transform_0, window_bounds = array<i64: 512, 108>}, {transform_indices = @transform_1, window_bounds = array<i64: 108, 128>}, {transform_indices = @transform_2, window_bounds = array<i64: 1, 128>}, {transform_indices = @transform_3, window_bounds = array<i64: 512, 128>}]} {
    %c0 = arith.constant 0 : index
    %c0_0 = arith.constant 0 : index
    %0 = vector.load %arg2[%c0, %c0_0] : memref<512x108xbf16, #tpu.memory_space<vmem>>, vector<512x108xbf16>
    %c0_1 = arith.constant 0 : index
    %c0_2 = arith.constant 0 : index
    %1 = vector.load %arg3[%c0_1, %c0_2] : memref<108x128xbf16, #tpu.memory_space<vmem>>, vector<108x128xbf16>
    %cst = arith.constant dense<0.000000e+00> : vector<512x128xf32>
    %2 = tpu.matmul %0, %1, %cst {dimension_numbers = #tpu.dot_dimension_numbers<[1], [0], [0], [1], [0, 0, 1, 1], [], []>} : vector<512x108xbf16>, vector<108x128xbf16>, vector<512x128xf32> -> vector<512x128xf32>
    %c0_3 = arith.constant 0 : index
    %c0_4 = arith.constant 0 : index
    %3 = vector.load %arg4[%c0_3, %c0_4] : memref<1x128xf32, #tpu.memory_space<vmem>>, vector<1x128xf32>
    %4 = vector.broadcast %3 : vector<1x128xf32> to vector<512x128xf32>
    %5 = arith.addf %2, %4 : vector<512x128xf32>
    %cst_5 = arith.constant 0.000000e+00 : f32
    %6 = vector.broadcast %cst_5 : f32 to vector<512x128xf32>
    %7 = arith.maximumf %5, %6 : vector<512x128xf32>
    %8 = arith.truncf %7 : vector<512x128xf32> to vector<512x128xbf16>
    %c0_6 = arith.constant 0 : index
    %c0_7 = arith.constant 0 : index
    %9 = vector.load %arg5[%c0_6, %c0_7] : memref<512x128xbf16, #tpu.memory_space<vmem>>, vector<512x128xbf16>
    tpu.vector_store %arg5[%c0_6, %c0_7], %8 {strides = array<i32>} : memref<512x128xbf16, #tpu.memory_space<vmem>>, vector<512x128xbf16>,
    return
  }
  func.func @transform_0(%arg0: i32, %arg1: i32) -> (i32, i32) {
    %c0_i32 = arith.constant 0 : i32
    %c0_i32_0 = arith.constant 0 : i32
    return %arg0, %c0_i32 : i32, i32
  }
  func.func @transform_1(%arg0: i32, %arg1: i32) -> (i32, i32) {
    %c0_i32 = arith.constant 0 : i32
    %c0_i32_0 = arith.constant 0 : i32
    return %c0_i32, %arg1 : i32, i32
  }
  func.func @transform_2(%arg0: i32, %arg1: i32) -> (i32, i32) {
    %c0_i32 = arith.constant 0 : i32
    %c0_i32_0 = arith.constant 0 : i32
    return %c0_i32, %arg1 : i32, i32
  }
  func.func @transform_3(%arg0: i32, %arg1: i32) -> (i32, i32) {
    %c0_i32 = arith.constant 0 : i32
    return %arg0, %arg1 : i32, i32
  }
}

module attributes {stable_mosaic.version = 11 : i64} {
  func.func @_conv_bn_kernel_1k(%arg0: i32, %arg1: i32, %arg2: memref<512x108xbf16, #tpu.memory_space<vmem>>, %arg3: memref<108x128xbf16, #tpu.memory_space<vmem>>, %arg4: memref<1x128xf32, #tpu.memory_space<vmem>>, %arg5: memref<512x128xf32, #tpu.memory_space<vmem>>, %arg6: memref<512x128xf32, #tpu.memory_space<vmem>>) attributes {dimension_semantics = [#tpu.dimension_semantics<parallel>, #tpu.dimension_semantics<parallel>], iteration_bounds = array<i64: 2, 1>, scalar_prefetch = 0 : i64, scratch_operands = 0 : i64, tpu.core_type = #tpu.core_type<tc>, window_params = [{transform_indices = @transform_0, window_bounds = array<i64: 512, 108>}, {transform_indices = @transform_1, window_bounds = array<i64: 108, 128>}, {transform_indices = @transform_2, window_bounds = array<i64: 1, 128>}, {transform_indices = @transform_3, window_bounds = array<i64: 512, 128>}, {transform_indices = @transform_4, window_bounds = array<i64: 512, 128>}]} {
    %c0 = arith.constant 0 : index
    %c0_0 = arith.constant 0 : index
    %0 = vector.load %arg2[%c0, %c0_0] : memref<512x108xbf16, #tpu.memory_space<vmem>>, vector<512x108xbf16>
    %c0_1 = arith.constant 0 : index
    %c0_2 = arith.constant 0 : index
    %1 = vector.load %arg3[%c0_1, %c0_2] : memref<108x128xbf16, #tpu.memory_space<vmem>>, vector<108x128xbf16>
    %cst = arith.constant dense<0.000000e+00> : vector<512x128xf32>
    %2 = tpu.matmul %0, %1, %cst {dimension_numbers = #tpu.dot_dimension_numbers<[1], [0], [0], [1], [0, 0, 1, 1], [], []>} : vector<512x108xbf16>, vector<108x128xbf16>, vector<512x128xf32> -> vector<512x128xf32>
    %c0_3 = arith.constant 0 : index
    %c0_4 = arith.constant 0 : index
    %3 = vector.load %arg4[%c0_3, %c0_4] : memref<1x128xf32, #tpu.memory_space<vmem>>, vector<1x128xf32>
    %4 = vector.broadcast %3 : vector<1x128xf32> to vector<512x128xf32>
    %5 = arith.addf %2, %4 : vector<512x128xf32>
    %c0_5 = arith.constant 0 : index
    %c0_6 = arith.constant 0 : index
    %6 = vector.load %arg5[%c0_5, %c0_6] : memref<512x128xf32, #tpu.memory_space<vmem>>, vector<512x128xf32>
    %7 = arith.addf %5, %6 : vector<512x128xf32>
    %cst_7 = arith.constant 0.000000e+00 : f32
    %8 = vector.broadcast %cst_7 : f32 to vector<512x128xf32>
    %9 = arith.maximumf %7, %8 : vector<512x128xf32>
    %c0_8 = arith.constant 0 : index
    %c0_9 = arith.constant 0 : index
    %10 = vector.load %arg6[%c0_8, %c0_9] : memref<512x128xf32, #tpu.memory_space<vmem>>, vector<512x128xf32>
    tpu.vector_store %arg6[%c0_8, %c0_9], %9 {strides = array<i32>} : memref<512x128xf32, #tpu.memory_space<vmem>>, vector<512x128xf32>,
    return
  }
  func.func @transform_0(%arg0: i32, %arg1: i32) -> (i32, i32) {
    %c0_i32 = arith.constant 0 : i32
    %c0_i32_0 = arith.constant 0 : i32
    return %arg0, %c0_i32 : i32, i32
  }
  func.func @transform_1(%arg0: i32, %arg1: i32) -> (i32, i32) {
    %c0_i32 = arith.constant 0 : i32
    %c0_i32_0 = arith.constant 0 : i32
    return %c0_i32, %arg1 : i32, i32
  }
  func.func @transform_2(%arg0: i32, %arg1: i32) -> (i32, i32) {
    %c0_i32 = arith.constant 0 : i32
    %c0_i32_0 = arith.constant 0 : i32
    return %c0_i32, %arg1 : i32, i32
  }
  func.func @transform_3(%arg0: i32, %arg1: i32) -> (i32, i32) {
    %c0_i32 = arith.constant 0 : i32
    return %arg0, %arg1 : i32, i32
  }
  func.func @transform_4(%arg0: i32, %arg1: i32) -> (i32, i32) {
    %c0_i32 = arith.constant 0 : i32
    return %arg0, %arg1 : i32, i32
  }
}

</mosaic_0001>

<bundles_post_ra>
// kernel: basic_block_dec_forward.2
= control target key start
LH: loop header
LB: loop body
LE: loop exit
PB: predicated region body
PF: predicated region fallthrough
CT: control target
= control target key end

     0   :  { %s1594_s12 = smov 0   ;;  %s1596_s13 = smov 0   ;;  %s1830_s0 = inlined_call_operand.vmem [shape: bf16[1024,108], index: 0, kind: input, shape index: {}]   ;;  %s1831_s1 = inlined_call_operand.vmem [shape: bf16[108,128], index: 1, kind: input, shape index: {}]   ;;  %s1832_s2 = inlined_call_operand.vmem [shape: f32[1,128], index: 2, kind: input, shape index: {}]   ;;  %s1833_s3 = inlined_call_operand.vmem [shape: bf16[1024,128], index: 3, kind: output, shape index: {}]  }
   0x1   :  { %s1598_s14 = smov 0  }
   0x2 LB: > { %s25_s15 = sadd.s32 1, %s1568_s13  ;;  %p1079_p0 = scmp.ge.s32.totalorder %s1572_s14, 1  ;;  %s1572_s14 = sphi %s1598_s14, %s13_s14   ;;  %s1568_s13 = sphi %s1596_s13, %s1835_s13   ;;  %s1564_s12 = sphi %s1594_s12, %s1834_s12  }
   0x3   : > { %p27_p1 = scmp.ge.s32.totalorder %s25_s15, 2  ;;  %p169_p2 = scmp.lt.s32.totalorder %s1572_s14, 3 }
   0x5   : > { %s1837_s15 = smov (%p27_p1, %s25_s15), 0  ;;  %p170_p3 = pnand %p1079_p0, %p169_p2 }
   0x6   : > { %s1080_s24 = sshll.u32 (!%p170_p3), %s1564_s12, 6 }
   0x7   : > { %173 = sbr.rel (%p170_p3) target bundleno = 304 (0x130), region = 32  ;;  %p204_p4 = scmp.lt.s32.totalorder (!%p170_p3), %s1080_s24, 127 }
   0xc   : > { %v1238_v0 = vld [vmem:[%s1831_s1 + $0x30] sm:$0xf]  ;;  %v1312_v1 = vld [vmem:[%s1831_s1 + $0x30] sm:$0x30]  ;;  %vm606_vm0 = vcmask 1045504   ;;  %v1311_v4 = vld [vmem:[%s1831_s1 + $0x28] sm:$0xff] }
   0xd   : > { %v1239_v2 = vor.u32 %v1312_v1, %v1238_v0  ;;  %v1310_v5 = vld [vmem:[%s1831_s1 + $0x20] sm:$0xff]  ;;  %v1309_v6 = vld [vmem:[%s1831_s1 + $0x18] sm:$0xff]  ;;  %v1308_v7 = vld [vmem:[%s1831_s1 + $0x10] sm:$0xff]  ;;  %s1839_s24 = smov (!%p204_p4, %s1080_s24), 127  ;;  %vm509_vm1 = vcmask 883712  }
   0xe   : > { %v1307_v8 = vld [vmem:[%s1831_s1 + $0x8] sm:$0xff]  ;;  %s1081_s4 = sshll.u32 %s1839_s24, 2  ;;  %v1306_v9 = vld [vmem:[%s1831_s1] sm:$0xff] }
   0xf   : > { %v608_v3 = vsel %vm606_vm0, %v1239_v2, 0  ;;  %s1647_s9 = scalar_lea.vmem %s1830_s0, %s1081_s4  ;;  %v1716_v44 = vld [vmem:[%s1832_s2] ss:$0 sm:$0xff]  ;;  %s1727_s17 = scalar_lea.vmem %s1833_s3, %s1081_s4 }
  0x10   : > { %611 = vmatpush.bf16.msra.mxu0 %v608_v3  ;;  %1504 = vmatpush.bf16.msra.mxu1 %v608_v3  ;;  %v1274_v10 = vld [vmem:[%s1647_s9] sm:$0xff]  ;;  %v1275_v14 = vld [vmem:[%s1647_s9 + $0x8] sm:$0xff]  ;;  %v1276_v18 = vld [vmem:[%s1647_s9 + $0x10] sm:$0xff] }
  0x11   : > { %1505 = vmatpush.bf16.msra.mxu2 %v608_v3  ;;  %1506 = vmatpush.bf16.msra.mxu3 %v608_v3  ;;  %v1282_v11 = vld [vmem:[%s1647_s9 + $0x40] sm:$0xff]  ;;  %v1283_v15 = vld [vmem:[%s1647_s9 + $0x48] sm:$0xff]  ;;  %v1284_v19 = vld [vmem:[%s1647_s9 + $0x50] sm:$0xff] }
  0x12   : > { %v1290_v12 = vld [vmem:[%s1647_s9 + $0x80] sm:$0xff]  ;;  %v1291_v16 = vld [vmem:[%s1647_s9 + $0x88] sm:$0xff]  ;;  %v1292_v20 = vld [vmem:[%s1647_s9 + $0x90] sm:$0xff] }
  0x13   : > { %v1298_v13 = vld [vmem:[%s1647_s9 + $0xc0] sm:$0xff]  ;;  %v1299_v17 = vld [vmem:[%s1647_s9 + $0xc8] sm:$0xff]  ;;  %v1300_v21 = vld [vmem:[%s1647_s9 + $0xd0] sm:$0xff] }
  0x14   : > { %612 = vmatpush.bf16.msra.mxu0 %v1311_v4  ;;  %1507 = vmatpush.bf16.msra.mxu1 %v1311_v4  ;;  %v1277_v22 = vld [vmem:[%s1647_s9 + $0x18] sm:$0xff]  ;;  %v1278_v26 = vld [vmem:[%s1647_s9 + $0x20] sm:$0xff]  ;;  %v1279_v30 = vld [vmem:[%s1647_s9 + $0x28] sm:$0xff] }
  0x15   : > { %1508 = vmatpush.bf16.msra.mxu2 %v1311_v4  ;;  %1509 = vmatpush.bf16.msra.mxu3 %v1311_v4  ;;  %v1285_v23 = vld [vmem:[%s1647_s9 + $0x58] sm:$0xff]  ;;  %v1286_v27 = vld [vmem:[%s1647_s9 + $0x60] sm:$0xff]  ;;  %v1287_v31 = vld [vmem:[%s1647_s9 + $0x68] sm:$0xff] }
  0x16   : > { %v1293_v24 = vld [vmem:[%s1647_s9 + $0x98] sm:$0xff]  ;;  %v1294_v28 = vld [vmem:[%s1647_s9 + $0xa0] sm:$0xff]  ;;  %v1295_v32 = vld [vmem:[%s1647_s9 + $0xa8] sm:$0xff] }
  0x17   : > { %v1301_v25 = vld [vmem:[%s1647_s9 + $0xd8] sm:$0xff]  ;;  %v1302_v29 = vld [vmem:[%s1647_s9 + $0xe0] sm:$0xff]  ;;  %v1303_v33 = vld [vmem:[%s1647_s9 + $0xe8] sm:$0xff] }
  0x18   : > { %613 = vmatpush.bf16.msra.mxu0 %v1310_v5  ;;  %1510 = vmatpush.bf16.msra.mxu1 %v1310_v5  ;;  %v1280_v34 = vld [vmem:[%s1647_s9 + $0x30] sm:$0xff]  ;;  %v1281_v38 = vld [vmem:[%s1647_s9 + $0x38] sm:$0xff] }
  0x19   : > { %1511 = vmatpush.bf16.msra.mxu2 %v1310_v5  ;;  %1512 = vmatpush.bf16.msra.mxu3 %v1310_v5  ;;  %v1288_v35 = vld [vmem:[%s1647_s9 + $0x70] sm:$0xff]  ;;  %v1289_v39 = vld [vmem:[%s1647_s9 + $0x78] sm:$0xff] }
  0x1a   : > { %v1296_v36 = vld [vmem:[%s1647_s9 + $0xb0] sm:$0xff]  ;;  %v1297_v40 = vld [vmem:[%s1647_s9 + $0xb8] sm:$0xff] }
  0x1b   : > { %v1304_v37 = vld [vmem:[%s1647_s9 + $0xf0] sm:$0xff]  ;;  %v1305_v41 = vld [vmem:[%s1647_s9 + $0xf8] sm:$0xff] }
  0x1c   : > { %614 = vmatpush.bf16.msra.mxu0 %v1309_v6  ;;  %1513 = vmatpush.bf16.msra.mxu1 %v1309_v6 }
  0x1d   : > { %1514 = vmatpush.bf16.msra.mxu2 %v1309_v6  ;;  %1515 = vmatpush.bf16.msra.mxu3 %v1309_v6 }
  0x20   : > { %615 = vmatpush.bf16.msra.mxu0 %v1308_v7  ;;  %1516 = vmatpush.bf16.msra.mxu1 %v1308_v7 }
  0x21   : > { %1517 = vmatpush.bf16.msra.mxu2 %v1308_v7  ;;  %1518 = vmatpush.bf16.msra.mxu3 %v1308_v7 }
  0x24   : > { %616 = vmatpush.bf16.msra.mxu0 %v1307_v8  ;;  %1519 = vmatpush.bf16.msra.mxu1 %v1307_v8 }
  0x25   : > { %1520 = vmatpush.bf16.msra.mxu2 %v1307_v8  ;;  %1521 = vmatpush.bf16.msra.mxu3 %v1307_v8 }
  0x28   : > { %617 = vmatpush.bf16.msra.mxu0 %v1306_v9  ;;  %1522 = vmatpush.bf16.msra.mxu1 %v1306_v9 }
  0x29   : > { %1523 = vmatpush.bf16.msra.mxu2 %v1306_v9  ;;  %1524 = vmatpush.bf16.msra.mxu3 %v1306_v9 }
  0x2b   : > { %1240 = vmatmul.msk.bf16.vlgmr.msra.gmra.mxu0 %vm509_vm1, %v1274_v10  ;;  %1248 = vmatmul.msk.bf16.vlgmr.msra.gmra.mxu1 %vm509_vm1, %v1282_v11 }
  0x2c   : > { %1256 = vmatmul.msk.bf16.vlgmr.msra.gmra.mxu2 %vm509_vm1, %v1290_v12  ;;  %1264 = vmatmul.msk.bf16.vlgmr.msra.gmra.mxu3 %vm509_vm1, %v1298_v13 }
  0x3b   : > { %1241 = vmatmul.msk.bf16.gmra.mxu0 %vm509_vm1, %v1275_v14  ;;  %1249 = vmatmul.msk.bf16.gmra.mxu1 %vm509_vm1, %v1283_v15 }
  0x3c   : > { %1257 = vmatmul.msk.bf16.gmra.mxu2 %vm509_vm1, %v1291_v16  ;;  %1265 = vmatmul.msk.bf16.gmra.mxu3 %vm509_vm1, %v1299_v17 }
  0x4b   : > { %1242 = vmatmul.msk.bf16.gmra.mxu0 %vm509_vm1, %v1276_v18  ;;  %1250 = vmatmul.msk.bf16.gmra.mxu1 %vm509_vm1, %v1284_v19 }
  0x4c   : > { %1258 = vmatmul.msk.bf16.gmra.mxu2 %vm509_vm1, %v1292_v20  ;;  %1266 = vmatmul.msk.bf16.gmra.mxu3 %vm509_vm1, %v1300_v21 }
  0x5b   : > { %1243 = vmatmul.msk.bf16.gmra.mxu0 %vm509_vm1, %v1277_v22  ;;  %1251 = vmatmul.msk.bf16.gmra.mxu1 %vm509_vm1, %v1285_v23 }
  0x5c   : > { %1259 = vmatmul.msk.bf16.gmra.mxu2 %vm509_vm1, %v1293_v24  ;;  %1267 = vmatmul.msk.bf16.gmra.mxu3 %vm509_vm1, %v1301_v25 }
  0x6b   : > { %1244 = vmatmul.msk.bf16.gmra.mxu0 %vm509_vm1, %v1278_v26  ;;  %1252 = vmatmul.msk.bf16.gmra.mxu1 %vm509_vm1, %v1286_v27 }
  0x6c   : > { %1260 = vmatmul.msk.bf16.gmra.mxu2 %vm509_vm1, %v1294_v28  ;;  %1268 = vmatmul.msk.bf16.gmra.mxu3 %vm509_vm1, %v1302_v29 }
  0x7b   : > { %1245 = vmatmul.msk.bf16.gmra.mxu0 %vm509_vm1, %v1279_v30  ;;  %1253 = vmatmul.msk.bf16.gmra.mxu1 %vm509_vm1, %v1287_v31 }
  0x7c   : > { %1261 = vmatmul.msk.bf16.gmra.mxu2 %vm509_vm1, %v1295_v32  ;;  %1269 = vmatmul.msk.bf16.gmra.mxu3 %vm509_vm1, %v1303_v33 }
  0x8b   : > { %1246 = vmatmul.msk.bf16.gmra.mxu0 %vm509_vm1, %v1280_v34  ;;  %1254 = vmatmul.msk.bf16.gmra.mxu1 %vm509_vm1, %v1288_v35 }
  0x8c   : > { %1262 = vmatmul.msk.bf16.gmra.mxu2 %vm509_vm1, %v1296_v36  ;;  %1270 = vmatmul.msk.bf16.gmra.mxu3 %vm509_vm1, %v1304_v37 }
  0x9b   : > { %1247 = vmatmul.msk.bf16.gmra.mxu0 %vm509_vm1, %v1281_v38  ;;  %1255 = vmatmul.msk.bf16.gmra.mxu1 %vm509_vm1, %v1289_v39 }
  0x9c   : > { %1263 = vmatmul.msk.bf16.gmra.mxu2 %vm509_vm1, %v1297_v40  ;;  %1271 = vmatmul.msk.bf16.gmra.mxu3 %vm509_vm1, %v1305_v41 }
  0xa8   : > { %v619_v42 = vpop.f32.mrf.mxu0  ;;  %v659_v43 = vpop.f32.mrf.mxu1 }
  0xa9   : > { %v620_v45 = vadd.f32 %v1716_v44, %v619_v42  ;;  %v660_v46 = vadd.f32 %v1716_v44, %v659_v43 }
  0xab   : > { %v779_v53 = vmax.f32 %v620_v45, 0.0  ;;  %v795_v54 = vmax.f32 %v660_v46, 0.0 }
  0xaf   : > { %v699_v47 = vpop.f32.mrf.mxu2  ;;  %v739_v48 = vpop.f32.mrf.mxu3 }
  0xb0   : > { %v621_v49 = vpop.f32.mrf.mxu0  ;;  %v661_v50 = vpop.f32.mrf.mxu1  ;;  %v700_v59 = vadd.f32 %v1716_v44, %v699_v47  ;;  %v740_v60 = vadd.f32 %v1716_v44, %v739_v48 }
  0xb1   : > { %v622_v51 = vadd.f32 %v1716_v44, %v621_v49  ;;  %v662_v52 = vadd.f32 %v1716_v44, %v661_v50 }
  0xb2   : > { %v811_v3 = vmax.f32 %v700_v59, 0.0  ;;  %v827_v4 = vmax.f32 %v740_v60, 0.0 }
  0xb3   : > { %v780_v55 = vmax.f32 %v622_v51, 0.0  ;;  %v796_v56 = vmax.f32 %v662_v52, 0.0 }
  0xb5   : > { %v1316_v57 = vpack.c.bf16 %v780_v55, %v779_v53  ;;  %v1356_v58 = vpack.c.bf16 %v796_v56, %v795_v54 }
  0xb7   : > { %1317 = vst [vmem:[%s1727_s17] sm:$0xff] %v1316_v57   ;;  %v701_v61 = vpop.f32.mrf.mxu2  ;;  %v741_v62 = vpop.f32.mrf.mxu3 }
  0xb8   : > { %1480 = vst [vmem:[%s1727_s17 + $0x40] sm:$0xff] %v1356_v58   ;;  %v702_v63 = vadd.f32 %v1716_v44, %v701_v61  ;;  %v742_v0 = vadd.f32 %v1716_v44, %v741_v62  ;;  %v624_v1 = vpop.f32.mrf.mxu0  ;;  %v664_v2 = vpop.f32.mrf.mxu1 }
  0xb9   : > { %v625_v9 = vadd.f32 %v1716_v44, %v624_v1  ;;  %v665_v10 = vadd.f32 %v1716_v44, %v664_v2 }
  0xba   : > { %v812_v5 = vmax.f32 %v702_v63, 0.0  ;;  %v828_v6 = vmax.f32 %v742_v0, 0.0 }
  0xbb   : > { %v781_v17 = vmax.f32 %v625_v9, 0.0  ;;  %v797_v18 = vmax.f32 %v665_v10, 0.0 }
  0xbc   : > { %v1396_v7 = vpack.c.bf16 %v812_v5, %v811_v3  ;;  %v1436_v8 = vpack.c.bf16 %v828_v6, %v827_v4 }
  0xbe   : > { %1488 = vst [vmem:[%s1727_s17 + $0x80] sm:$0xff] %v1396_v7  }
  0xbf   : > { %1496 = vst [vmem:[%s1727_s17 + $0xc0] sm:$0xff] %v1436_v8   ;;  %v704_v11 = vpop.f32.mrf.mxu2  ;;  %v744_v12 = vpop.f32.mrf.mxu3 }
  0xc0   : > { %v626_v13 = vpop.f32.mrf.mxu0  ;;  %v666_v14 = vpop.f32.mrf.mxu1  ;;  %v705_v23 = vadd.f32 %v1716_v44, %v704_v11  ;;  %v745_v24 = vadd.f32 %v1716_v44, %v744_v12 }
  0xc1   : > { %v627_v15 = vadd.f32 %v1716_v44, %v626_v13  ;;  %v667_v16 = vadd.f32 %v1716_v44, %v666_v14 }
  0xc2   : > { %v813_v31 = vmax.f32 %v705_v23, 0.0  ;;  %v829_v32 = vmax.f32 %v745_v24, 0.0 }
  0xc3   : > { %v782_v19 = vmax.f32 %v627_v15, 0.0  ;;  %v798_v20 = vmax.f32 %v667_v16, 0.0 }
  0xc5   : > { %v1321_v21 = vpack.c.bf16 %v782_v19, %v781_v17  ;;  %v1361_v22 = vpack.c.bf16 %v798_v20, %v797_v18 }
  0xc7   : > { %1473 = vst [vmem:[%s1727_s17 + $0x8] sm:$0xff] %v1321_v21   ;;  %v706_v25 = vpop.f32.mrf.mxu2  ;;  %v746_v26 = vpop.f32.mrf.mxu3 }
  0xc8   : > { %1481 = vst [vmem:[%s1727_s17 + $0x48] sm:$0xff] %v1361_v22   ;;  %v707_v27 = vadd.f32 %v1716_v44, %v706_v25  ;;  %v747_v28 = vadd.f32 %v1716_v44, %v746_v26  ;;  %v629_v29 = vpop.f32.mrf.mxu0  ;;  %v669_v30 = vpop.f32.mrf.mxu1 }
  0xc9   : > { %v630_v37 = vadd.f32 %v1716_v44, %v629_v29  ;;  %v670_v38 = vadd.f32 %v1716_v44, %v669_v30 }
  0xca   : > { %v814_v33 = vmax.f32 %v707_v27, 0.0  ;;  %v830_v34 = vmax.f32 %v747_v28, 0.0 }
  0xcb   : > { %v783_v46 = vmax.f32 %v630_v37, 0.0  ;;  %v799_v47 = vmax.f32 %v670_v38, 0.0 }
  0xcc   : > { %v1401_v35 = vpack.c.bf16 %v814_v33, %v813_v31  ;;  %v1441_v36 = vpack.c.bf16 %v830_v34, %v829_v32 }
  0xce   : > { %1489 = vst [vmem:[%s1727_s17 + $0x88] sm:$0xff] %v1401_v35  }
  0xcf   : > { %1497 = vst [vmem:[%s1727_s17 + $0xc8] sm:$0xff] %v1441_v36   ;;  %v709_v39 = vpop.f32.mrf.mxu2  ;;  %v749_v40 = vpop.f32.mrf.mxu3 }
  0xd0   : > { %v631_v41 = vpop.f32.mrf.mxu0  ;;  %v671_v42 = vpop.f32.mrf.mxu1  ;;  %v710_v52 = vadd.f32 %v1716_v44, %v709_v39  ;;  %v750_v53 = vadd.f32 %v1716_v44, %v749_v40 }
  0xd1   : > { %v632_v43 = vadd.f32 %v1716_v44, %v631_v41  ;;  %v672_v45 = vadd.f32 %v1716_v44, %v671_v42 }
  0xd2   : > { %v815_v60 = vmax.f32 %v710_v52, 0.0  ;;  %v831_v61 = vmax.f32 %v750_v53, 0.0 }
  0xd3   : > { %v784_v48 = vmax.f32 %v632_v43, 0.0  ;;  %v800_v49 = vmax.f32 %v672_v45, 0.0 }
  0xd5   : > { %v1326_v50 = vpack.c.bf16 %v784_v48, %v783_v46  ;;  %v1366_v51 = vpack.c.bf16 %v800_v49, %v799_v47 }
  0xd7   : > { %1474 = vst [vmem:[%s1727_s17 + $0x10] sm:$0xff] %v1326_v50   ;;  %v711_v54 = vpop.f32.mrf.mxu2  ;;  %v751_v55 = vpop.f32.mrf.mxu3 }
  0xd8   : > { %1482 = vst [vmem:[%s1727_s17 + $0x50] sm:$0xff] %v1366_v51   ;;  %v712_v56 = vadd.f32 %v1716_v44, %v711_v54  ;;  %v752_v57 = vadd.f32 %v1716_v44, %v751_v55  ;;  %v634_v58 = vpop.f32.mrf.mxu0  ;;  %v674_v59 = vpop.f32.mrf.mxu1 }
  0xd9   : > { %v635_v2 = vadd.f32 %v1716_v44, %v634_v58  ;;  %v675_v3 = vadd.f32 %v1716_v44, %v674_v59 }
  0xda   : > { %v816_v62 = vmax.f32 %v712_v56, 0.0  ;;  %v832_v63 = vmax.f32 %v752_v57, 0.0 }
  0xdb   : > { %v785_v10 = vmax.f32 %v635_v2, 0.0  ;;  %v801_v11 = vmax.f32 %v675_v3, 0.0 }
  0xdc   : > { %v1406_v0 = vpack.c.bf16 %v816_v62, %v815_v60  ;;  %v1446_v1 = vpack.c.bf16 %v832_v63, %v831_v61 }
  0xde   : > { %1490 = vst [vmem:[%s1727_s17 + $0x90] sm:$0xff] %v1406_v0  }
  0xdf   : > { %1498 = vst [vmem:[%s1727_s17 + $0xd0] sm:$0xff] %v1446_v1   ;;  %v714_v4 = vpop.f32.mrf.mxu2  ;;  %v754_v5 = vpop.f32.mrf.mxu3 }
  0xe0   : > { %v636_v6 = vpop.f32.mrf.mxu0  ;;  %v676_v7 = vpop.f32.mrf.mxu1  ;;  %v715_v16 = vadd.f32 %v1716_v44, %v714_v4  ;;  %v755_v17 = vadd.f32 %v1716_v44, %v754_v5 }
  0xe1   : > { %v637_v8 = vadd.f32 %v1716_v44, %v636_v6  ;;  %v677_v9 = vadd.f32 %v1716_v44, %v676_v7 }
  0xe2   : > { %v817_v24 = vmax.f32 %v715_v16, 0.0  ;;  %v833_v25 = vmax.f32 %v755_v17, 0.0 }
  0xe3   : > { %v786_v12 = vmax.f32 %v637_v8, 0.0  ;;  %v802_v13 = vmax.f32 %v677_v9, 0.0 }
  0xe5   : > { %v1331_v14 = vpack.c.bf16 %v786_v12, %v785_v10  ;;  %v1371_v15 = vpack.c.bf16 %v802_v13, %v801_v11 }
  0xe7   : > { %1475 = vst [vmem:[%s1727_s17 + $0x18] sm:$0xff] %v1331_v14   ;;  %v716_v18 = vpop.f32.mrf.mxu2  ;;  %v756_v19 = vpop.f32.mrf.mxu3 }
  0xe8   : > { %1483 = vst [vmem:[%s1727_s17 + $0x58] sm:$0xff] %v1371_v15   ;;  %v717_v20 = vadd.f32 %v1716_v44, %v716_v18  ;;  %v757_v21 = vadd.f32 %v1716_v44, %v756_v19  ;;  %v639_v22 = vpop.f32.mrf.mxu0  ;;  %v679_v23 = vpop.f32.mrf.mxu1 }
  0xe9   : > { %v640_v30 = vadd.f32 %v1716_v44, %v639_v22  ;;  %v680_v31 = vadd.f32 %v1716_v44, %v679_v23 }
  0xea   : > { %v818_v26 = vmax.f32 %v717_v20, 0.0  ;;  %v834_v27 = vmax.f32 %v757_v21, 0.0 }
  0xeb   : > { %v787_v38 = vmax.f32 %v640_v30, 0.0  ;;  %v803_v39 = vmax.f32 %v680_v31, 0.0 }
  0xec   : > { %v1411_v28 = vpack.c.bf16 %v818_v26, %v817_v24  ;;  %v1451_v29 = vpack.c.bf16 %v834_v27, %v833_v25 }
  0xee   : > { %1491 = vst [vmem:[%s1727_s17 + $0x98] sm:$0xff] %v1411_v28  }
  0xef   : > { %1499 = vst [vmem:[%s1727_s17 + $0xd8] sm:$0xff] %v1451_v29   ;;  %v719_v32 = vpop.f32.mrf.mxu2  ;;  %v759_v33 = vpop.f32.mrf.mxu3 }
  0xf0   : > { %v641_v34 = vpop.f32.mrf.mxu0  ;;  %v681_v35 = vpop.f32.mrf.mxu1  ;;  %v720_v45 = vadd.f32 %v1716_v44, %v719_v32  ;;  %v760_v46 = vadd.f32 %v1716_v44, %v759_v33 }
  0xf1   : > { %v642_v36 = vadd.f32 %v1716_v44, %v641_v34  ;;  %v682_v37 = vadd.f32 %v1716_v44, %v681_v35 }
  0xf2   : > { %v819_v53 = vmax.f32 %v720_v45, 0.0  ;;  %v835_v54 = vmax.f32 %v760_v46, 0.0 }
  0xf3   : > { %v788_v40 = vmax.f32 %v642_v36, 0.0  ;;  %v804_v41 = vmax.f32 %v682_v37, 0.0 }
  0xf5   : > { %v1336_v42 = vpack.c.bf16 %v788_v40, %v787_v38  ;;  %v1376_v43 = vpack.c.bf16 %v804_v41, %v803_v39 }
  0xf7   : > { %1476 = vst [vmem:[%s1727_s17 + $0x20] sm:$0xff] %v1336_v42   ;;  %v721_v47 = vpop.f32.mrf.mxu2  ;;  %v761_v48 = vpop.f32.mrf.mxu3 }
  0xf8   : > { %1484 = vst [vmem:[%s1727_s17 + $0x60] sm:$0xff] %v1376_v43   ;;  %v722_v49 = vadd.f32 %v1716_v44, %v721_v47  ;;  %v762_v50 = vadd.f32 %v1716_v44, %v761_v48  ;;  %v644_v51 = vpop.f32.mrf.mxu0  ;;  %v684_v52 = vpop.f32.mrf.mxu1 }
  0xf9   : > { %v645_v59 = vadd.f32 %v1716_v44, %v644_v51  ;;  %v685_v60 = vadd.f32 %v1716_v44, %v684_v52 }
  0xfa   : > { %v820_v55 = vmax.f32 %v722_v49, 0.0  ;;  %v836_v56 = vmax.f32 %v762_v50, 0.0 }
  0xfb   : > { %v789_v3 = vmax.f32 %v645_v59, 0.0  ;;  %v805_v4 = vmax.f32 %v685_v60, 0.0 }
  0xfc   : > { %v1416_v57 = vpack.c.bf16 %v820_v55, %v819_v53  ;;  %v1456_v58 = vpack.c.bf16 %v836_v56, %v835_v54 }
  0xfe   : > { %1492 = vst [vmem:[%s1727_s17 + $0xa0] sm:$0xff] %v1416_v57  }
  0xff   : > { %1500 = vst [vmem:[%s1727_s17 + $0xe0] sm:$0xff] %v1456_v58   ;;  %v724_v61 = vpop.f32.mrf.mxu2  ;;  %v764_v62 = vpop.f32.mrf.mxu3 }
 0x100   : > { %v646_v63 = vpop.f32.mrf.mxu0  ;;  %v686_v0 = vpop.f32.mrf.mxu1  ;;  %v725_v9 = vadd.f32 %v1716_v44, %v724_v61  ;;  %v765_v10 = vadd.f32 %v1716_v44, %v764_v62 }
 0x101   : > { %v647_v1 = vadd.f32 %v1716_v44, %v646_v63  ;;  %v687_v2 = vadd.f32 %v1716_v44, %v686_v0 }
 0x102   : > { %v821_v17 = vmax.f32 %v725_v9, 0.0  ;;  %v837_v18 = vmax.f32 %v765_v10, 0.0 }
 0x103   : > { %v790_v5 = vmax.f32 %v647_v1, 0.0  ;;  %v806_v6 = vmax.f32 %v687_v2, 0.0 }
 0x105   : > { %v1341_v7 = vpack.c.bf16 %v790_v5, %v789_v3  ;;  %v1381_v8 = vpack.c.bf16 %v806_v6, %v805_v4 }
 0x107   : > { %1477 = vst [vmem:[%s1727_s17 + $0x28] sm:$0xff] %v1341_v7   ;;  %v726_v11 = vpop.f32.mrf.mxu2  ;;  %v766_v12 = vpop.f32.mrf.mxu3 }
 0x108   : > { %1485 = vst [vmem:[%s1727_s17 + $0x68] sm:$0xff] %v1381_v8   ;;  %v727_v13 = vadd.f32 %v1716_v44, %v726_v11  ;;  %v767_v14 = vadd.f32 %v1716_v44, %v766_v12  ;;  %v649_v15 = vpop.f32.mrf.mxu0  ;;  %v689_v16 = vpop.f32.mrf.mxu1 }
 0x109   : > { %v650_v23 = vadd.f32 %v1716_v44, %v649_v15  ;;  %v690_v24 = vadd.f32 %v1716_v44, %v689_v16 }
 0x10a   : > { %v822_v19 = vmax.f32 %v727_v13, 0.0  ;;  %v838_v20 = vmax.f32 %v767_v14, 0.0 }
 0x10b   : > { %v791_v31 = vmax.f32 %v650_v23, 0.0  ;;  %v807_v32 = vmax.f32 %v690_v24, 0.0 }
 0x10c   : > { %v1421_v21 = vpack.c.bf16 %v822_v19, %v821_v17  ;;  %v1461_v22 = vpack.c.bf16 %v838_v20, %v837_v18 }
 0x10e   : > { %1493 = vst [vmem:[%s1727_s17 + $0xa8] sm:$0xff] %v1421_v21  }
 0x10f   : > { %1501 = vst [vmem:[%s1727_s17 + $0xe8] sm:$0xff] %v1461_v22   ;;  %v729_v25 = vpop.f32.mrf.mxu2  ;;  %v769_v26 = vpop.f32.mrf.mxu3 }
 0x110   : > { %v651_v27 = vpop.f32.mrf.mxu0  ;;  %v691_v28 = vpop.f32.mrf.mxu1  ;;  %v730_v37 = vadd.f32 %v1716_v44, %v729_v25  ;;  %v770_v38 = vadd.f32 %v1716_v44, %v769_v26 }
 0x111   : > { %v652_v29 = vadd.f32 %v1716_v44, %v651_v27  ;;  %v692_v30 = vadd.f32 %v1716_v44, %v691_v28 }
 0x112   : > { %v823_v46 = vmax.f32 %v730_v37, 0.0  ;;  %v839_v47 = vmax.f32 %v770_v38, 0.0 }
 0x113   : > { %v792_v33 = vmax.f32 %v652_v29, 0.0  ;;  %v808_v34 = vmax.f32 %v692_v30, 0.0 }
 0x115   : > { %v1346_v35 = vpack.c.bf16 %v792_v33, %v791_v31  ;;  %v1386_v36 = vpack.c.bf16 %v808_v34, %v807_v32 }
 0x117   : > { %1478 = vst [vmem:[%s1727_s17 + $0x30] sm:$0xff] %v1346_v35   ;;  %v731_v39 = vpop.f32.mrf.mxu2  ;;  %v771_v40 = vpop.f32.mrf.mxu3 }
 0x118   : > { %1486 = vst [vmem:[%s1727_s17 + $0x70] sm:$0xff] %v1386_v36   ;;  %v732_v41 = vadd.f32 %v1716_v44, %v731_v39  ;;  %v772_v42 = vadd.f32 %v1716_v44, %v771_v40  ;;  %v654_v43 = vpop.f32.mrf.mxu0  ;;  %v694_v45 = vpop.f32.mrf.mxu1 }
 0x119   : > { %v655_v52 = vadd.f32 %v1716_v44, %v654_v43  ;;  %v695_v53 = vadd.f32 %v1716_v44, %v694_v45 }
 0x11a   : > { %v824_v48 = vmax.f32 %v732_v41, 0.0  ;;  %v840_v49 = vmax.f32 %v772_v42, 0.0 }
 0x11b   : > { %v793_v60 = vmax.f32 %v655_v52, 0.0  ;;  %v809_v61 = vmax.f32 %v695_v53, 0.0 }
 0x11c   : > { %v1426_v50 = vpack.c.bf16 %v824_v48, %v823_v46  ;;  %v1466_v51 = vpack.c.bf16 %v840_v49, %v839_v47 }
 0x11e   : > { %1494 = vst [vmem:[%s1727_s17 + $0xb0] sm:$0xff] %v1426_v50  }
 0x11f   : > { %1502 = vst [vmem:[%s1727_s17 + $0xf0] sm:$0xff] %v1466_v51   ;;  %v734_v54 = vpop.f32.mrf.mxu2  ;;  %v774_v55 = vpop.f32.mrf.mxu3 }
 0x120   : > { %v656_v56 = vpop.f32.mrf.mxu0  ;;  %v696_v57 = vpop.f32.mrf.mxu1  ;;  %v735_v2 = vadd.f32 %v1716_v44, %v734_v54  ;;  %v775_v3 = vadd.f32 %v1716_v44, %v774_v55 }
 0x121   : > { %v657_v58 = vadd.f32 %v1716_v44, %v656_v56  ;;  %v697_v59 = vadd.f32 %v1716_v44, %v696_v57 }
 0x122   : > { %v825_v8 = vmax.f32 %v735_v2, 0.0  ;;  %v841_v9 = vmax.f32 %v775_v3, 0.0 }
 0x123   : > { %v794_v62 = vmax.f32 %v657_v58, 0.0  ;;  %v810_v63 = vmax.f32 %v697_v59, 0.0 }
 0x125   : > { %v1351_v0 = vpack.c.bf16 %v794_v62, %v793_v60  ;;  %v1391_v1 = vpack.c.bf16 %v810_v63, %v809_v61 }
 0x127   : > { %1479 = vst [vmem:[%s1727_s17 + $0x38] sm:$0xff] %v1351_v0   ;;  %v736_v4 = vpop.f32.mrf.mxu2  ;;  %v776_v5 = vpop.f32.mrf.mxu3 }
 0x128   : > { %1487 = vst [vmem:[%s1727_s17 + $0x78] sm:$0xff] %v1391_v1   ;;  %v737_v6 = vadd.f32 %v1716_v44, %v736_v4  ;;  %v777_v7 = vadd.f32 %v1716_v44, %v776_v5 }
 0x12a   : > { %v826_v10 = vmax.f32 %v737_v6, 0.0  ;;  %v842_v11 = vmax.f32 %v777_v7, 0.0 }
 0x12c   : > { %v1431_v12 = vpack.c.bf16 %v826_v10, %v825_v8  ;;  %v1471_v13 = vpack.c.bf16 %v842_v11, %v841_v9 }
 0x12e   : > { %1495 = vst [vmem:[%s1727_s17 + $0xb8] sm:$0xff] %v1431_v12  }
 0x12f   : > { %1503 = vst [vmem:[%s1727_s17 + $0xf8] sm:$0xff] %v1471_v13  }
 0x130 PF: > { %s13_s14 = sadd.s32 1, %s1572_s14   ;;  %s1834_s12 = smov %s1568_s13 }
 0x131   : > { %p10_p5 = scmp.ge.s32.totalorder %s13_s14, 4   ;;  %s1835_s13 = smov %s1837_s15 }
 0x133   :  { %12 = sbr.rel (!%p10_p5) target bundleno = 2 (0x2), region = 68 }

// kernel: basic_block_dec_forward.3
= control target key start
LH: loop header
LB: loop body
LE: loop exit
PB: predicated region body
PF: predicated region fallthrough
CT: control target
= control target key end

     0   :  { %s1549_s15 = smov 0   ;;  %s1551_s16 = smov 0   ;;  %s1883_s0 = inlined_call_operand.vmem [shape: bf16[1024,108], index: 0, kind: input, shape index: {}]   ;;  %s1884_s1 = inlined_call_operand.vmem [shape: bf16[108,128], index: 1, kind: input, shape index: {}]   ;;  %s1885_s2 = inlined_call_operand.vmem [shape: f32[1,128], index: 2, kind: input, shape index: {}]   ;;  %s1886_s3 = inlined_call_operand.vmem [shape: f32[1024,128], index: 3, kind: input, shape index: {}]   ;;  %s1887_s4 = inlined_call_operand.vmem [shape: f32[1024,128], index: 4, kind: output, shape index: {}]  }
   0x1   :  { %s1553_s17 = smov 0  }
   0x2 LB: > { %s26_s18 = sadd.s32 1, %s1518_s16  ;;  %p1218_p0 = scmp.ge.s32.totalorder %s1522_s17, 1  ;;  %s1522_s17 = sphi %s1553_s17, %s14_s17   ;;  %s1518_s16 = sphi %s1551_s16, %s1889_s16   ;;  %s1514_s15 = sphi %s1549_s15, %s1888_s15  }
   0x3   : > { %p28_p1 = scmp.ge.s32.totalorder %s26_s18, 2  ;;  %p210_p2 = scmp.lt.s32.totalorder %s1522_s17, 3 }
   0x5   : > { %s1891_s18 = smov (%p28_p1, %s26_s18), 0  ;;  %p211_p3 = pnand %p1218_p0, %p210_p2 }
   0x6   : > { %s1219_s27 = sshll.u32 (!%p211_p3), %s1514_s15, 6 }
   0x7   : > { %214 = sbr.rel (%p211_p3) target bundleno = 304 (0x130), region = 36  ;;  %p255_p4 = scmp.lt.s32.totalorder (!%p211_p3), %s1219_s27, 127 }
   0xc   : > { %v1379_v0 = vld [vmem:[%s1884_s1 + $0x30] sm:$0xf]  ;;  %v1453_v1 = vld [vmem:[%s1884_s1 + $0x30] sm:$0x30]  ;;  %vm666_vm0 = vcmask 1045504   ;;  %v1452_v4 = vld [vmem:[%s1884_s1 + $0x28] sm:$0xff] }
   0xd   : > { %v1380_v2 = vor.u32 %v1453_v1, %v1379_v0  ;;  %v1451_v5 = vld [vmem:[%s1884_s1 + $0x20] sm:$0xff]  ;;  %v1450_v6 = vld [vmem:[%s1884_s1 + $0x18] sm:$0xff]  ;;  %v1449_v7 = vld [vmem:[%s1884_s1 + $0x10] sm:$0xff]  ;;  %s1893_s27 = smov (!%p255_p4, %s1219_s27), 127  ;;  %vm569_vm1 = vcmask 883712  }
   0xe   : > { %v1448_v8 = vld [vmem:[%s1884_s1 + $0x8] sm:$0xff]  ;;  %s1220_s8 = sshll.u32 %s1893_s27, 2  ;;  %v1447_v9 = vld [vmem:[%s1884_s1] sm:$0xff]  ;;  %s1222_s14 = sshll.u32 %s1893_s27, 3 }
   0xf   : > { %v668_v3 = vsel %vm666_vm0, %v1380_v2, 0  ;;  %s1600_s13 = scalar_lea.vmem %s1883_s0, %s1220_s8  ;;  %s1670_s20 = scalar_lea.vmem %s1886_s3, %s1222_s14  ;;  %v1675_v42 = vld [vmem:[%s1885_s2] ss:$0 sm:$0xff] }
  0x10   : > { %671 = vmatpush.bf16.msra.mxu0 %v668_v3  ;;  %1454 = vmatpush.bf16.msra.mxu1 %v668_v3  ;;  %v1415_v10 = vld [vmem:[%s1600_s13] sm:$0xff]  ;;  %v1416_v14 = vld [vmem:[%s1600_s13 + $0x8] sm:$0xff]  ;;  %v1417_v18 = vld [vmem:[%s1600_s13 + $0x10] sm:$0xff]  ;;  %s1684_s25 = scalar_lea.vmem %s1887_s4, %s1222_s14 }
  0x11   : > { %1455 = vmatpush.bf16.msra.mxu2 %v668_v3  ;;  %1456 = vmatpush.bf16.msra.mxu3 %v668_v3  ;;  %v1423_v11 = vld [vmem:[%s1600_s13 + $0x40] sm:$0xff]  ;;  %v1424_v15 = vld [vmem:[%s1600_s13 + $0x48] sm:$0xff]  ;;  %v1425_v19 = vld [vmem:[%s1600_s13 + $0x50] sm:$0xff] }
  0x12   : > { %v1431_v12 = vld [vmem:[%s1600_s13 + $0x80] sm:$0xff]  ;;  %v1432_v16 = vld [vmem:[%s1600_s13 + $0x88] sm:$0xff]  ;;  %v1433_v20 = vld [vmem:[%s1600_s13 + $0x90] sm:$0xff] }
  0x13   : > { %v1439_v13 = vld [vmem:[%s1600_s13 + $0xc0] sm:$0xff]  ;;  %v1440_v17 = vld [vmem:[%s1600_s13 + $0xc8] sm:$0xff]  ;;  %v1441_v21 = vld [vmem:[%s1600_s13 + $0xd0] sm:$0xff] }
  0x14   : > { %672 = vmatpush.bf16.msra.mxu0 %v1452_v4  ;;  %1457 = vmatpush.bf16.msra.mxu1 %v1452_v4  ;;  %v1418_v22 = vld [vmem:[%s1600_s13 + $0x18] sm:$0xff]  ;;  %v1419_v26 = vld [vmem:[%s1600_s13 + $0x20] sm:$0xff]  ;;  %v1420_v30 = vld [vmem:[%s1600_s13 + $0x28] sm:$0xff] }
  0x15   : > { %1458 = vmatpush.bf16.msra.mxu2 %v1452_v4  ;;  %1459 = vmatpush.bf16.msra.mxu3 %v1452_v4  ;;  %v1426_v23 = vld [vmem:[%s1600_s13 + $0x58] sm:$0xff]  ;;  %v1427_v27 = vld [vmem:[%s1600_s13 + $0x60] sm:$0xff]  ;;  %v1428_v31 = vld [vmem:[%s1600_s13 + $0x68] sm:$0xff] }
  0x16   : > { %v1434_v24 = vld [vmem:[%s1600_s13 + $0x98] sm:$0xff]  ;;  %v1435_v28 = vld [vmem:[%s1600_s13 + $0xa0] sm:$0xff]  ;;  %v1436_v32 = vld [vmem:[%s1600_s13 + $0xa8] sm:$0xff] }
  0x17   : > { %v1442_v25 = vld [vmem:[%s1600_s13 + $0xd8] sm:$0xff]  ;;  %v1443_v29 = vld [vmem:[%s1600_s13 + $0xe0] sm:$0xff]  ;;  %v1444_v33 = vld [vmem:[%s1600_s13 + $0xe8] sm:$0xff] }
  0x18   : > { %673 = vmatpush.bf16.msra.mxu0 %v1451_v5  ;;  %1460 = vmatpush.bf16.msra.mxu1 %v1451_v5  ;;  %v1421_v34 = vld [vmem:[%s1600_s13 + $0x30] sm:$0xff]  ;;  %v1422_v38 = vld [vmem:[%s1600_s13 + $0x38] sm:$0xff]  ;;  %v839_v44 = vld [vmem:[%s1670_s20] sm:$0xff] }
  0x19   : > { %1461 = vmatpush.bf16.msra.mxu2 %v1451_v5  ;;  %1462 = vmatpush.bf16.msra.mxu3 %v1451_v5  ;;  %v1429_v35 = vld [vmem:[%s1600_s13 + $0x70] sm:$0xff]  ;;  %v1430_v39 = vld [vmem:[%s1600_s13 + $0x78] sm:$0xff]  ;;  %v855_v46 = vld [vmem:[%s1670_s20 + $0x80] sm:$0xff] }
  0x1a   : > { %v1437_v36 = vld [vmem:[%s1600_s13 + $0xb0] sm:$0xff]  ;;  %v1438_v40 = vld [vmem:[%s1600_s13 + $0xb8] sm:$0xff]  ;;  %v871_v54 = vld [vmem:[%s1670_s20 + $0x100] sm:$0xff] }
  0x1b   : > { %v1445_v37 = vld [vmem:[%s1600_s13 + $0xf0] sm:$0xff]  ;;  %v1446_v41 = vld [vmem:[%s1600_s13 + $0xf8] sm:$0xff]  ;;  %v887_v56 = vld [vmem:[%s1670_s20 + $0x180] sm:$0xff] }
  0x1c   : > { %674 = vmatpush.bf16.msra.mxu0 %v1450_v6  ;;  %1463 = vmatpush.bf16.msra.mxu1 %v1450_v6  ;;  %v840_v60 = vld [vmem:[%s1670_s20 + $0x8] sm:$0xff] }
  0x1d   : > { %1464 = vmatpush.bf16.msra.mxu2 %v1450_v6  ;;  %1465 = vmatpush.bf16.msra.mxu3 %v1450_v6  ;;  %v856_v62 = vld [vmem:[%s1670_s20 + $0x88] sm:$0xff] }
  0x20   : > { %675 = vmatpush.bf16.msra.mxu0 %v1449_v7  ;;  %1466 = vmatpush.bf16.msra.mxu1 %v1449_v7 }
  0x21   : > { %1467 = vmatpush.bf16.msra.mxu2 %v1449_v7  ;;  %1468 = vmatpush.bf16.msra.mxu3 %v1449_v7 }
  0x24   : > { %676 = vmatpush.bf16.msra.mxu0 %v1448_v8  ;;  %1469 = vmatpush.bf16.msra.mxu1 %v1448_v8 }
  0x25   : > { %1470 = vmatpush.bf16.msra.mxu2 %v1448_v8  ;;  %1471 = vmatpush.bf16.msra.mxu3 %v1448_v8 }
  0x28   : > { %677 = vmatpush.bf16.msra.mxu0 %v1447_v9  ;;  %1472 = vmatpush.bf16.msra.mxu1 %v1447_v9 }
  0x29   : > { %1473 = vmatpush.bf16.msra.mxu2 %v1447_v9  ;;  %1474 = vmatpush.bf16.msra.mxu3 %v1447_v9 }
  0x2b   : > { %1381 = vmatmul.msk.bf16.vlgmr.msra.gmra.mxu0 %vm569_vm1, %v1415_v10  ;;  %1389 = vmatmul.msk.bf16.vlgmr.msra.gmra.mxu1 %vm569_vm1, %v1423_v11  ;;  %v872_v10 = vld [vmem:[%s1670_s20 + $0x108] sm:$0xff] }
  0x2c   : > { %1397 = vmatmul.msk.bf16.vlgmr.msra.gmra.mxu2 %vm569_vm1, %v1431_v12  ;;  %1405 = vmatmul.msk.bf16.vlgmr.msra.gmra.mxu3 %vm569_vm1, %v1439_v13  ;;  %v888_v12 = vld [vmem:[%s1670_s20 + $0x188] sm:$0xff] }
  0x3b   : > { %1382 = vmatmul.msk.bf16.gmra.mxu0 %vm569_vm1, %v1416_v14  ;;  %1390 = vmatmul.msk.bf16.gmra.mxu1 %vm569_vm1, %v1424_v15 }
  0x3c   : > { %1398 = vmatmul.msk.bf16.gmra.mxu2 %vm569_vm1, %v1432_v16  ;;  %1406 = vmatmul.msk.bf16.gmra.mxu3 %vm569_vm1, %v1440_v17  ;;  %v841_v16 = vld [vmem:[%s1670_s20 + $0x10] sm:$0xff] }
  0x4b   : > { %1383 = vmatmul.msk.bf16.gmra.mxu0 %vm569_vm1, %v1417_v18  ;;  %1391 = vmatmul.msk.bf16.gmra.mxu1 %vm569_vm1, %v1425_v19  ;;  %v857_v18 = vld [vmem:[%s1670_s20 + $0x90] sm:$0xff] }
  0x4c   : > { %1399 = vmatmul.msk.bf16.gmra.mxu2 %vm569_vm1, %v1433_v20  ;;  %1407 = vmatmul.msk.bf16.gmra.mxu3 %vm569_vm1, %v1441_v21 }
  0x5b   : > { %1384 = vmatmul.msk.bf16.gmra.mxu0 %vm569_vm1, %v1418_v22  ;;  %1392 = vmatmul.msk.bf16.gmra.mxu1 %vm569_vm1, %v1426_v23 }
  0x5c   : > { %1400 = vmatmul.msk.bf16.gmra.mxu2 %vm569_vm1, %v1434_v24  ;;  %1408 = vmatmul.msk.bf16.gmra.mxu3 %vm569_vm1, %v1442_v25 }
  0x6b   : > { %1385 = vmatmul.msk.bf16.gmra.mxu0 %vm569_vm1, %v1419_v26  ;;  %1393 = vmatmul.msk.bf16.gmra.mxu1 %vm569_vm1, %v1427_v27 }
  0x6c   : > { %1401 = vmatmul.msk.bf16.gmra.mxu2 %vm569_vm1, %v1435_v28  ;;  %1409 = vmatmul.msk.bf16.gmra.mxu3 %vm569_vm1, %v1443_v29 }
  0x7b   : > { %1386 = vmatmul.msk.bf16.gmra.mxu0 %vm569_vm1, %v1420_v30  ;;  %1394 = vmatmul.msk.bf16.gmra.mxu1 %vm569_vm1, %v1428_v31  ;;  %v873_v30 = vld [vmem:[%s1670_s20 + $0x110] sm:$0xff] }
  0x7c   : > { %1402 = vmatmul.msk.bf16.gmra.mxu2 %vm569_vm1, %v1436_v32  ;;  %1410 = vmatmul.msk.bf16.gmra.mxu3 %vm569_vm1, %v1444_v33  ;;  %v889_v32 = vld [vmem:[%s1670_s20 + $0x190] sm:$0xff] }
  0x8b   : > { %1387 = vmatmul.msk.bf16.gmra.mxu0 %vm569_vm1, %v1421_v34  ;;  %1395 = vmatmul.msk.bf16.gmra.mxu1 %vm569_vm1, %v1429_v35 }
  0x8c   : > { %1403 = vmatmul.msk.bf16.gmra.mxu2 %vm569_vm1, %v1437_v36  ;;  %1411 = vmatmul.msk.bf16.gmra.mxu3 %vm569_vm1, %v1445_v37  ;;  %v842_v36 = vld [vmem:[%s1670_s20 + $0x18] sm:$0xff] }
  0x9b   : > { %1388 = vmatmul.msk.bf16.gmra.mxu0 %vm569_vm1, %v1422_v38  ;;  %1396 = vmatmul.msk.bf16.gmra.mxu1 %vm569_vm1, %v1430_v39  ;;  %v858_v38 = vld [vmem:[%s1670_s20 + $0x98] sm:$0xff] }
  0x9c   : > { %1404 = vmatmul.msk.bf16.gmra.mxu2 %vm569_vm1, %v1438_v40  ;;  %1412 = vmatmul.msk.bf16.gmra.mxu3 %vm569_vm1, %v1446_v41 }
  0xa8   : > { %v679_v43 = vpop.f32.mrf.mxu0  ;;  %v719_v45 = vpop.f32.mrf.mxu1 }
  0xa9   : > { %v680_v47 = vadd.f32 %v1675_v42, %v679_v43  ;;  %v720_v48 = vadd.f32 %v1675_v42, %v719_v45 }
  0xab   : > { %v903_v49 = vadd.f32 %v839_v44, %v680_v47  ;;  %v919_v50 = vadd.f32 %v855_v46, %v720_v48 }
  0xad   : > { %v967_v51 = vmax.f32 %v903_v49, 0.0  ;;  %v983_v52 = vmax.f32 %v919_v50, 0.0 }
  0xaf   : > { %1031 = vst [vmem:[%s1684_s25] sm:$0xff] %v967_v51  ;;  %v759_v53 = vpop.f32.mrf.mxu2  ;;  %v799_v55 = vpop.f32.mrf.mxu3  ;;  %v874_v51 = vld [vmem:[%s1670_s20 + $0x118] sm:$0xff] }
  0xb0   : > { %1047 = vst [vmem:[%s1684_s25 + $0x80] sm:$0xff] %v983_v52  ;;  %v760_v57 = vadd.f32 %v1675_v42, %v759_v53  ;;  %v800_v58 = vadd.f32 %v1675_v42, %v799_v55  ;;  %v681_v59 = vpop.f32.mrf.mxu0  ;;  %v721_v61 = vpop.f32.mrf.mxu1  ;;  %v890_v53 = vld [vmem:[%s1670_s20 + $0x198] sm:$0xff] }
  0xb1   : > { %v682_v63 = vadd.f32 %v1675_v42, %v681_v59  ;;  %v722_v0 = vadd.f32 %v1675_v42, %v721_v61  ;;  %v859_v59 = vld [vmem:[%s1670_s20 + $0xa0] sm:$0xff] }
  0xb2   : > { %v935_v1 = vadd.f32 %v871_v54, %v760_v57  ;;  %v951_v2 = vadd.f32 %v887_v56, %v800_v58  ;;  %v843_v57 = vld [vmem:[%s1670_s20 + $0x20] sm:$0xff] }
  0xb3   : > { %v904_v3 = vadd.f32 %v840_v60, %v682_v63  ;;  %v920_v4 = vadd.f32 %v856_v62, %v722_v0 }
  0xb4   : > { %v999_v5 = vmax.f32 %v935_v1, 0.0  ;;  %v1015_v6 = vmax.f32 %v951_v2, 0.0 }
  0xb5   : > { %v968_v7 = vmax.f32 %v904_v3, 0.0  ;;  %v984_v8 = vmax.f32 %v920_v4, 0.0 }
  0xb6   : > { %1063 = vst [vmem:[%s1684_s25 + $0x100] sm:$0xff] %v999_v5 }
  0xb7   : > { %1079 = vst [vmem:[%s1684_s25 + $0x180] sm:$0xff] %v1015_v6  ;;  %v761_v9 = vpop.f32.mrf.mxu2  ;;  %v801_v11 = vpop.f32.mrf.mxu3 }
  0xb8   : > { %1032 = vst [vmem:[%s1684_s25 + $0x8] sm:$0xff] %v968_v7  ;;  %v762_v13 = vadd.f32 %v1675_v42, %v761_v9  ;;  %v802_v14 = vadd.f32 %v1675_v42, %v801_v11  ;;  %v684_v15 = vpop.f32.mrf.mxu0  ;;  %v724_v17 = vpop.f32.mrf.mxu1  ;;  %v875_v7 = vld [vmem:[%s1670_s20 + $0x120] sm:$0xff] }
  0xb9   : > { %1048 = vst [vmem:[%s1684_s25 + $0x88] sm:$0xff] %v984_v8  ;;  %v685_v19 = vadd.f32 %v1675_v42, %v684_v15  ;;  %v725_v20 = vadd.f32 %v1675_v42, %v724_v17  ;;  %v891_v9 = vld [vmem:[%s1670_s20 + $0x1a0] sm:$0xff]  ;;  %v860_v15 = vld [vmem:[%s1670_s20 + $0xa8] sm:$0xff] }
  0xba   : > { %v936_v21 = vadd.f32 %v872_v10, %v762_v13  ;;  %v952_v22 = vadd.f32 %v888_v12, %v802_v14  ;;  %v844_v13 = vld [vmem:[%s1670_s20 + $0x28] sm:$0xff] }
  0xbb   : > { %v905_v23 = vadd.f32 %v841_v16, %v685_v19  ;;  %v921_v24 = vadd.f32 %v857_v18, %v725_v20 }
  0xbc   : > { %v1000_v25 = vmax.f32 %v936_v21, 0.0  ;;  %v1016_v26 = vmax.f32 %v952_v22, 0.0 }
  0xbd   : > { %v969_v27 = vmax.f32 %v905_v23, 0.0  ;;  %v985_v28 = vmax.f32 %v921_v24, 0.0 }
  0xbe   : > { %1064 = vst [vmem:[%s1684_s25 + $0x108] sm:$0xff] %v1000_v25 }
  0xbf   : > { %1080 = vst [vmem:[%s1684_s25 + $0x188] sm:$0xff] %v1016_v26  ;;  %v764_v29 = vpop.f32.mrf.mxu2  ;;  %v804_v31 = vpop.f32.mrf.mxu3 }
  0xc0   : > { %1033 = vst [vmem:[%s1684_s25 + $0x10] sm:$0xff] %v969_v27  ;;  %v765_v33 = vadd.f32 %v1675_v42, %v764_v29  ;;  %v805_v34 = vadd.f32 %v1675_v42, %v804_v31  ;;  %v686_v35 = vpop.f32.mrf.mxu0  ;;  %v726_v37 = vpop.f32.mrf.mxu1  ;;  %v876_v27 = vld [vmem:[%s1670_s20 + $0x128] sm:$0xff] }
  0xc1   : > { %1049 = vst [vmem:[%s1684_s25 + $0x90] sm:$0xff] %v985_v28  ;;  %v687_v39 = vadd.f32 %v1675_v42, %v686_v35  ;;  %v727_v40 = vadd.f32 %v1675_v42, %v726_v37  ;;  %v892_v29 = vld [vmem:[%s1670_s20 + $0x1a8] sm:$0xff]  ;;  %v861_v35 = vld [vmem:[%s1670_s20 + $0xb0] sm:$0xff] }
  0xc2   : > { %v937_v41 = vadd.f32 %v873_v30, %v765_v33  ;;  %v953_v43 = vadd.f32 %v889_v32, %v805_v34  ;;  %v845_v33 = vld [vmem:[%s1670_s20 + $0x30] sm:$0xff] }
  0xc3   : > { %v906_v44 = vadd.f32 %v842_v36, %v687_v39  ;;  %v922_v45 = vadd.f32 %v858_v38, %v727_v40 }
  0xc4   : > { %v1001_v46 = vmax.f32 %v937_v41, 0.0  ;;  %v1017_v47 = vmax.f32 %v953_v43, 0.0 }
  0xc5   : > { %v970_v48 = vmax.f32 %v906_v44, 0.0  ;;  %v986_v49 = vmax.f32 %v922_v45, 0.0 }
  0xc6   : > { %1065 = vst [vmem:[%s1684_s25 + $0x110] sm:$0xff] %v1001_v46 }
  0xc7   : > { %1081 = vst [vmem:[%s1684_s25 + $0x190] sm:$0xff] %v1017_v47  ;;  %v766_v50 = vpop.f32.mrf.mxu2  ;;  %v806_v52 = vpop.f32.mrf.mxu3 }
  0xc8   : > { %1034 = vst [vmem:[%s1684_s25 + $0x18] sm:$0xff] %v970_v48  ;;  %v767_v54 = vadd.f32 %v1675_v42, %v766_v50  ;;  %v807_v55 = vadd.f32 %v1675_v42, %v806_v52  ;;  %v689_v56 = vpop.f32.mrf.mxu0  ;;  %v729_v58 = vpop.f32.mrf.mxu1  ;;  %v877_v48 = vld [vmem:[%s1670_s20 + $0x130] sm:$0xff] }
  0xc9   : > { %1050 = vst [vmem:[%s1684_s25 + $0x98] sm:$0xff] %v986_v49  ;;  %v690_v60 = vadd.f32 %v1675_v42, %v689_v56  ;;  %v730_v61 = vadd.f32 %v1675_v42, %v729_v58  ;;  %v893_v50 = vld [vmem:[%s1670_s20 + $0x1b0] sm:$0xff]  ;;  %v862_v56 = vld [vmem:[%s1670_s20 + $0xb8] sm:$0xff] }
  0xca   : > { %v938_v62 = vadd.f32 %v874_v51, %v767_v54  ;;  %v954_v63 = vadd.f32 %v890_v53, %v807_v55  ;;  %v846_v54 = vld [vmem:[%s1670_s20 + $0x38] sm:$0xff] }
  0xcb   : > { %v907_v0 = vadd.f32 %v843_v57, %v690_v60  ;;  %v923_v1 = vadd.f32 %v859_v59, %v730_v61 }
  0xcc   : > { %v1002_v2 = vmax.f32 %v938_v62, 0.0  ;;  %v1018_v3 = vmax.f32 %v954_v63, 0.0 }
  0xcd   : > { %v971_v4 = vmax.f32 %v907_v0, 0.0  ;;  %v987_v5 = vmax.f32 %v923_v1, 0.0 }
  0xce   : > { %1066 = vst [vmem:[%s1684_s25 + $0x118] sm:$0xff] %v1002_v2 }
  0xcf   : > { %1082 = vst [vmem:[%s1684_s25 + $0x198] sm:$0xff] %v1018_v3  ;;  %v769_v6 = vpop.f32.mrf.mxu2  ;;  %v809_v8 = vpop.f32.mrf.mxu3 }
  0xd0   : > { %1035 = vst [vmem:[%s1684_s25 + $0x20] sm:$0xff] %v971_v4  ;;  %v770_v10 = vadd.f32 %v1675_v42, %v769_v6  ;;  %v810_v11 = vadd.f32 %v1675_v42, %v809_v8  ;;  %v691_v12 = vpop.f32.mrf.mxu0  ;;  %v731_v14 = vpop.f32.mrf.mxu1  ;;  %v878_v4 = vld [vmem:[%s1670_s20 + $0x138] sm:$0xff] }
  0xd1   : > { %1051 = vst [vmem:[%s1684_s25 + $0xa0] sm:$0xff] %v987_v5  ;;  %v692_v16 = vadd.f32 %v1675_v42, %v691_v12  ;;  %v732_v17 = vadd.f32 %v1675_v42, %v731_v14  ;;  %v894_v6 = vld [vmem:[%s1670_s20 + $0x1b8] sm:$0xff]  ;;  %v863_v12 = vld [vmem:[%s1670_s20 + $0xc0] sm:$0xff] }
  0xd2   : > { %v939_v18 = vadd.f32 %v875_v7, %v770_v10  ;;  %v955_v19 = vadd.f32 %v891_v9, %v810_v11  ;;  %v847_v10 = vld [vmem:[%s1670_s20 + $0x40] sm:$0xff] }
  0xd3   : > { %v908_v20 = vadd.f32 %v844_v13, %v692_v16  ;;  %v924_v21 = vadd.f32 %v860_v15, %v732_v17 }
  0xd4   : > { %v1003_v22 = vmax.f32 %v939_v18, 0.0  ;;  %v1019_v23 = vmax.f32 %v955_v19, 0.0 }
  0xd5   : > { %v972_v24 = vmax.f32 %v908_v20, 0.0  ;;  %v988_v25 = vmax.f32 %v924_v21, 0.0 }
  0xd6   : > { %1067 = vst [vmem:[%s1684_s25 + $0x120] sm:$0xff] %v1003_v22 }
  0xd7   : > { %1083 = vst [vmem:[%s1684_s25 + $0x1a0] sm:$0xff] %v1019_v23  ;;  %v771_v26 = vpop.f32.mrf.mxu2  ;;  %v811_v28 = vpop.f32.mrf.mxu3 }
  0xd8   : > { %1036 = vst [vmem:[%s1684_s25 + $0x28] sm:$0xff] %v972_v24  ;;  %v772_v30 = vadd.f32 %v1675_v42, %v771_v26  ;;  %v812_v31 = vadd.f32 %v1675_v42, %v811_v28  ;;  %v694_v32 = vpop.f32.mrf.mxu0  ;;  %v734_v34 = vpop.f32.mrf.mxu1  ;;  %v879_v24 = vld [vmem:[%s1670_s20 + $0x140] sm:$0xff] }
  0xd9   : > { %1052 = vst [vmem:[%s1684_s25 + $0xa8] sm:$0xff] %v988_v25  ;;  %v695_v36 = vadd.f32 %v1675_v42, %v694_v32  ;;  %v735_v37 = vadd.f32 %v1675_v42, %v734_v34  ;;  %v895_v26 = vld [vmem:[%s1670_s20 + $0x1c0] sm:$0xff]  ;;  %v864_v32 = vld [vmem:[%s1670_s20 + $0xc8] sm:$0xff] }
  0xda   : > { %v940_v38 = vadd.f32 %v876_v27, %v772_v30  ;;  %v956_v39 = vadd.f32 %v892_v29, %v812_v31  ;;  %v848_v30 = vld [vmem:[%s1670_s20 + $0x48] sm:$0xff] }
  0xdb   : > { %v909_v40 = vadd.f32 %v845_v33, %v695_v36  ;;  %v925_v41 = vadd.f32 %v861_v35, %v735_v37 }
  0xdc   : > { %v1004_v43 = vmax.f32 %v940_v38, 0.0  ;;  %v1020_v44 = vmax.f32 %v956_v39, 0.0 }
  0xdd   : > { %v973_v45 = vmax.f32 %v909_v40, 0.0  ;;  %v989_v46 = vmax.f32 %v925_v41, 0.0 }
  0xde   : > { %1068 = vst [vmem:[%s1684_s25 + $0x128] sm:$0xff] %v1004_v43 }
  0xdf   : > { %1084 = vst [vmem:[%s1684_s25 + $0x1a8] sm:$0xff] %v1020_v44  ;;  %v774_v47 = vpop.f32.mrf.mxu2  ;;  %v814_v49 = vpop.f32.mrf.mxu3 }
  0xe0   : > { %1037 = vst [vmem:[%s1684_s25 + $0x30] sm:$0xff] %v973_v45  ;;  %v775_v51 = vadd.f32 %v1675_v42, %v774_v47  ;;  %v815_v52 = vadd.f32 %v1675_v42, %v814_v49  ;;  %v696_v53 = vpop.f32.mrf.mxu0  ;;  %v736_v55 = vpop.f32.mrf.mxu1  ;;  %v880_v45 = vld [vmem:[%s1670_s20 + $0x148] sm:$0xff] }
  0xe1   : > { %1053 = vst [vmem:[%s1684_s25 + $0xb0] sm:$0xff] %v989_v46  ;;  %v697_v57 = vadd.f32 %v1675_v42, %v696_v53  ;;  %v737_v58 = vadd.f32 %v1675_v42, %v736_v55  ;;  %v896_v47 = vld [vmem:[%s1670_s20 + $0x1c8] sm:$0xff]  ;;  %v865_v53 = vld [vmem:[%s1670_s20 + $0xd0] sm:$0xff] }
  0xe2   : > { %v941_v59 = vadd.f32 %v877_v48, %v775_v51  ;;  %v957_v60 = vadd.f32 %v893_v50, %v815_v52  ;;  %v849_v51 = vld [vmem:[%s1670_s20 + $0x50] sm:$0xff] }
  0xe3   : > { %v910_v61 = vadd.f32 %v846_v54, %v697_v57  ;;  %v926_v62 = vadd.f32 %v862_v56, %v737_v58 }
  0xe4   : > { %v1005_v63 = vmax.f32 %v941_v59, 0.0  ;;  %v1021_v0 = vmax.f32 %v957_v60, 0.0 }
  0xe5   : > { %v974_v1 = vmax.f32 %v910_v61, 0.0  ;;  %v990_v2 = vmax.f32 %v926_v62, 0.0 }
  0xe6   : > { %1069 = vst [vmem:[%s1684_s25 + $0x130] sm:$0xff] %v1005_v63 }
  0xe7   : > { %1085 = vst [vmem:[%s1684_s25 + $0x1b0] sm:$0xff] %v1021_v0  ;;  %v776_v3 = vpop.f32.mrf.mxu2  ;;  %v816_v5 = vpop.f32.mrf.mxu3 }
  0xe8   : > { %1038 = vst [vmem:[%s1684_s25 + $0x38] sm:$0xff] %v974_v1  ;;  %v777_v7 = vadd.f32 %v1675_v42, %v776_v3  ;;  %v817_v8 = vadd.f32 %v1675_v42, %v816_v5  ;;  %v699_v9 = vpop.f32.mrf.mxu0  ;;  %v739_v11 = vpop.f32.mrf.mxu1  ;;  %v881_v1 = vld [vmem:[%s1670_s20 + $0x150] sm:$0xff] }
  0xe9   : > { %1054 = vst [vmem:[%s1684_s25 + $0xb8] sm:$0xff] %v990_v2  ;;  %v700_v13 = vadd.f32 %v1675_v42, %v699_v9  ;;  %v740_v14 = vadd.f32 %v1675_v42, %v739_v11  ;;  %v897_v3 = vld [vmem:[%s1670_s20 + $0x1d0] sm:$0xff]  ;;  %v866_v9 = vld [vmem:[%s1670_s20 + $0xd8] sm:$0xff] }
  0xea   : > { %v942_v15 = vadd.f32 %v878_v4, %v777_v7  ;;  %v958_v16 = vadd.f32 %v894_v6, %v817_v8  ;;  %v850_v7 = vld [vmem:[%s1670_s20 + $0x58] sm:$0xff] }
  0xeb   : > { %v911_v17 = vadd.f32 %v847_v10, %v700_v13  ;;  %v927_v18 = vadd.f32 %v863_v12, %v740_v14 }
  0xec   : > { %v1006_v19 = vmax.f32 %v942_v15, 0.0  ;;  %v1022_v20 = vmax.f32 %v958_v16, 0.0 }
  0xed   : > { %v975_v21 = vmax.f32 %v911_v17, 0.0  ;;  %v991_v22 = vmax.f32 %v927_v18, 0.0 }
  0xee   : > { %1070 = vst [vmem:[%s1684_s25 + $0x138] sm:$0xff] %v1006_v19 }
  0xef   : > { %1086 = vst [vmem:[%s1684_s25 + $0x1b8] sm:$0xff] %v1022_v20  ;;  %v779_v23 = vpop.f32.mrf.mxu2  ;;  %v819_v25 = vpop.f32.mrf.mxu3 }
  0xf0   : > { %1039 = vst [vmem:[%s1684_s25 + $0x40] sm:$0xff] %v975_v21  ;;  %v780_v27 = vadd.f32 %v1675_v42, %v779_v23  ;;  %v820_v28 = vadd.f32 %v1675_v42, %v819_v25  ;;  %v701_v29 = vpop.f32.mrf.mxu0  ;;  %v741_v31 = vpop.f32.mrf.mxu1  ;;  %v882_v21 = vld [vmem:[%s1670_s20 + $0x158] sm:$0xff] }
  0xf1   : > { %1055 = vst [vmem:[%s1684_s25 + $0xc0] sm:$0xff] %v991_v22  ;;  %v702_v33 = vadd.f32 %v1675_v42, %v701_v29  ;;  %v742_v34 = vadd.f32 %v1675_v42, %v741_v31  ;;  %v898_v23 = vld [vmem:[%s1670_s20 + $0x1d8] sm:$0xff]  ;;  %v867_v29 = vld [vmem:[%s1670_s20 + $0xe0] sm:$0xff] }
  0xf2   : > { %v943_v35 = vadd.f32 %v879_v24, %v780_v27  ;;  %v959_v36 = vadd.f32 %v895_v26, %v820_v28  ;;  %v851_v27 = vld [vmem:[%s1670_s20 + $0x60] sm:$0xff] }
  0xf3   : > { %v912_v37 = vadd.f32 %v848_v30, %v702_v33  ;;  %v928_v38 = vadd.f32 %v864_v32, %v742_v34 }
  0xf4   : > { %v1007_v39 = vmax.f32 %v943_v35, 0.0  ;;  %v1023_v40 = vmax.f32 %v959_v36, 0.0 }
  0xf5   : > { %v976_v41 = vmax.f32 %v912_v37, 0.0  ;;  %v992_v43 = vmax.f32 %v928_v38, 0.0 }
  0xf6   : > { %1071 = vst [vmem:[%s1684_s25 + $0x140] sm:$0xff] %v1007_v39 }
  0xf7   : > { %1087 = vst [vmem:[%s1684_s25 + $0x1c0] sm:$0xff] %v1023_v40  ;;  %v781_v44 = vpop.f32.mrf.mxu2  ;;  %v821_v46 = vpop.f32.mrf.mxu3 }
  0xf8   : > { %1040 = vst [vmem:[%s1684_s25 + $0x48] sm:$0xff] %v976_v41  ;;  %v782_v48 = vadd.f32 %v1675_v42, %v781_v44  ;;  %v822_v49 = vadd.f32 %v1675_v42, %v821_v46  ;;  %v704_v50 = vpop.f32.mrf.mxu0  ;;  %v744_v52 = vpop.f32.mrf.mxu1  ;;  %v883_v41 = vld [vmem:[%s1670_s20 + $0x160] sm:$0xff] }
  0xf9   : > { %1056 = vst [vmem:[%s1684_s25 + $0xc8] sm:$0xff] %v992_v43  ;;  %v705_v54 = vadd.f32 %v1675_v42, %v704_v50  ;;  %v745_v55 = vadd.f32 %v1675_v42, %v744_v52  ;;  %v899_v44 = vld [vmem:[%s1670_s20 + $0x1e0] sm:$0xff]  ;;  %v868_v50 = vld [vmem:[%s1670_s20 + $0xe8] sm:$0xff] }
  0xfa   : > { %v944_v56 = vadd.f32 %v880_v45, %v782_v48  ;;  %v960_v57 = vadd.f32 %v896_v47, %v822_v49  ;;  %v852_v48 = vld [vmem:[%s1670_s20 + $0x68] sm:$0xff] }
  0xfb   : > { %v913_v58 = vadd.f32 %v849_v51, %v705_v54  ;;  %v929_v59 = vadd.f32 %v865_v53, %v745_v55 }
  0xfc   : > { %v1008_v60 = vmax.f32 %v944_v56, 0.0  ;;  %v1024_v61 = vmax.f32 %v960_v57, 0.0 }
  0xfd   : > { %v977_v62 = vmax.f32 %v913_v58, 0.0  ;;  %v993_v63 = vmax.f32 %v929_v59, 0.0 }
  0xfe   : > { %1072 = vst [vmem:[%s1684_s25 + $0x148] sm:$0xff] %v1008_v60 }
  0xff   : > { %1088 = vst [vmem:[%s1684_s25 + $0x1c8] sm:$0xff] %v1024_v61  ;;  %v784_v0 = vpop.f32.mrf.mxu2  ;;  %v824_v2 = vpop.f32.mrf.mxu3 }
 0x100   : > { %1041 = vst [vmem:[%s1684_s25 + $0x50] sm:$0xff] %v977_v62  ;;  %v785_v4 = vadd.f32 %v1675_v42, %v784_v0  ;;  %v825_v5 = vadd.f32 %v1675_v42, %v824_v2  ;;  %v706_v6 = vpop.f32.mrf.mxu0  ;;  %v746_v8 = vpop.f32.mrf.mxu1  ;;  %v884_v62 = vld [vmem:[%s1670_s20 + $0x168] sm:$0xff] }
 0x101   : > { %1057 = vst [vmem:[%s1684_s25 + $0xd0] sm:$0xff] %v993_v63  ;;  %v707_v10 = vadd.f32 %v1675_v42, %v706_v6  ;;  %v747_v11 = vadd.f32 %v1675_v42, %v746_v8  ;;  %v900_v0 = vld [vmem:[%s1670_s20 + $0x1e8] sm:$0xff]  ;;  %v869_v6 = vld [vmem:[%s1670_s20 + $0xf0] sm:$0xff] }
 0x102   : > { %v945_v12 = vadd.f32 %v881_v1, %v785_v4  ;;  %v961_v13 = vadd.f32 %v897_v3, %v825_v5  ;;  %v853_v4 = vld [vmem:[%s1670_s20 + $0x70] sm:$0xff] }
 0x103   : > { %v914_v14 = vadd.f32 %v850_v7, %v707_v10  ;;  %v930_v15 = vadd.f32 %v866_v9, %v747_v11 }
 0x104   : > { %v1009_v16 = vmax.f32 %v945_v12, 0.0  ;;  %v1025_v17 = vmax.f32 %v961_v13, 0.0 }
 0x105   : > { %v978_v18 = vmax.f32 %v914_v14, 0.0  ;;  %v994_v19 = vmax.f32 %v930_v15, 0.0 }
 0x106   : > { %1073 = vst [vmem:[%s1684_s25 + $0x150] sm:$0xff] %v1009_v16 }
 0x107   : > { %1089 = vst [vmem:[%s1684_s25 + $0x1d0] sm:$0xff] %v1025_v17  ;;  %v786_v20 = vpop.f32.mrf.mxu2  ;;  %v826_v22 = vpop.f32.mrf.mxu3 }
 0x108   : > { %1042 = vst [vmem:[%s1684_s25 + $0x58] sm:$0xff] %v978_v18  ;;  %v787_v24 = vadd.f32 %v1675_v42, %v786_v20  ;;  %v827_v25 = vadd.f32 %v1675_v42, %v826_v22  ;;  %v709_v26 = vpop.f32.mrf.mxu0  ;;  %v749_v28 = vpop.f32.mrf.mxu1  ;;  %v885_v18 = vld [vmem:[%s1670_s20 + $0x170] sm:$0xff] }
 0x109   : > { %1058 = vst [vmem:[%s1684_s25 + $0xd8] sm:$0xff] %v994_v19  ;;  %v710_v30 = vadd.f32 %v1675_v42, %v709_v26  ;;  %v750_v31 = vadd.f32 %v1675_v42, %v749_v28  ;;  %v901_v20 = vld [vmem:[%s1670_s20 + $0x1f0] sm:$0xff]  ;;  %v870_v26 = vld [vmem:[%s1670_s20 + $0xf8] sm:$0xff] }
 0x10a   : > { %v946_v32 = vadd.f32 %v882_v21, %v787_v24  ;;  %v962_v33 = vadd.f32 %v898_v23, %v827_v25  ;;  %v854_v24 = vld [vmem:[%s1670_s20 + $0x78] sm:$0xff] }
 0x10b   : > { %v915_v34 = vadd.f32 %v851_v27, %v710_v30  ;;  %v931_v35 = vadd.f32 %v867_v29, %v750_v31 }
 0x10c   : > { %v1010_v36 = vmax.f32 %v946_v32, 0.0  ;;  %v1026_v37 = vmax.f32 %v962_v33, 0.0 }
 0x10d   : > { %v979_v38 = vmax.f32 %v915_v34, 0.0  ;;  %v995_v39 = vmax.f32 %v931_v35, 0.0 }
 0x10e   : > { %1074 = vst [vmem:[%s1684_s25 + $0x158] sm:$0xff] %v1010_v36 }
 0x10f   : > { %1090 = vst [vmem:[%s1684_s25 + $0x1d8] sm:$0xff] %v1026_v37  ;;  %v789_v40 = vpop.f32.mrf.mxu2  ;;  %v829_v43 = vpop.f32.mrf.mxu3 }
 0x110   : > { %1043 = vst [vmem:[%s1684_s25 + $0x60] sm:$0xff] %v979_v38  ;;  %v790_v45 = vadd.f32 %v1675_v42, %v789_v40  ;;  %v830_v46 = vadd.f32 %v1675_v42, %v829_v43  ;;  %v711_v47 = vpop.f32.mrf.mxu0  ;;  %v751_v49 = vpop.f32.mrf.mxu1  ;;  %v886_v38 = vld [vmem:[%s1670_s20 + $0x178] sm:$0xff] }
 0x111   : > { %1059 = vst [vmem:[%s1684_s25 + $0xe0] sm:$0xff] %v995_v39  ;;  %v712_v51 = vadd.f32 %v1675_v42, %v711_v47  ;;  %v752_v52 = vadd.f32 %v1675_v42, %v751_v49  ;;  %v902_v40 = vld [vmem:[%s1670_s20 + $0x1f8] sm:$0xff] }
 0x112   : > { %v947_v53 = vadd.f32 %v883_v41, %v790_v45  ;;  %v963_v54 = vadd.f32 %v899_v44, %v830_v46 }
 0x113   : > { %v916_v55 = vadd.f32 %v852_v48, %v712_v51  ;;  %v932_v56 = vadd.f32 %v868_v50, %v752_v52 }
 0x114   : > { %v1011_v57 = vmax.f32 %v947_v53, 0.0  ;;  %v1027_v58 = vmax.f32 %v963_v54, 0.0 }
 0x115   : > { %v980_v59 = vmax.f32 %v916_v55, 0.0  ;;  %v996_v60 = vmax.f32 %v932_v56, 0.0 }
 0x116   : > { %1075 = vst [vmem:[%s1684_s25 + $0x160] sm:$0xff] %v1011_v57 }
 0x117   : > { %1091 = vst [vmem:[%s1684_s25 + $0x1e0] sm:$0xff] %v1027_v58  ;;  %v791_v61 = vpop.f32.mrf.mxu2  ;;  %v831_v63 = vpop.f32.mrf.mxu3 }
 0x118   : > { %1044 = vst [vmem:[%s1684_s25 + $0x68] sm:$0xff] %v980_v59  ;;  %v792_v1 = vadd.f32 %v1675_v42, %v791_v61  ;;  %v832_v2 = vadd.f32 %v1675_v42, %v831_v63  ;;  %v714_v3 = vpop.f32.mrf.mxu0  ;;  %v754_v5 = vpop.f32.mrf.mxu1 }
 0x119   : > { %1060 = vst [vmem:[%s1684_s25 + $0xe8] sm:$0xff] %v996_v60  ;;  %v715_v7 = vadd.f32 %v1675_v42, %v714_v3  ;;  %v755_v8 = vadd.f32 %v1675_v42, %v754_v5 }
 0x11a   : > { %v948_v9 = vadd.f32 %v884_v62, %v792_v1  ;;  %v964_v10 = vadd.f32 %v900_v0, %v832_v2 }
 0x11b   : > { %v917_v11 = vadd.f32 %v853_v4, %v715_v7  ;;  %v933_v12 = vadd.f32 %v869_v6, %v755_v8 }
 0x11c   : > { %v1012_v13 = vmax.f32 %v948_v9, 0.0  ;;  %v1028_v14 = vmax.f32 %v964_v10, 0.0 }
 0x11d   : > { %v981_v15 = vmax.f32 %v917_v11, 0.0  ;;  %v997_v16 = vmax.f32 %v933_v12, 0.0 }
 0x11e   : > { %1076 = vst [vmem:[%s1684_s25 + $0x168] sm:$0xff] %v1012_v13 }
 0x11f   : > { %1092 = vst [vmem:[%s1684_s25 + $0x1e8] sm:$0xff] %v1028_v14  ;;  %v794_v17 = vpop.f32.mrf.mxu2  ;;  %v834_v19 = vpop.f32.mrf.mxu3 }
 0x120   : > { %1045 = vst [vmem:[%s1684_s25 + $0x70] sm:$0xff] %v981_v15  ;;  %v795_v21 = vadd.f32 %v1675_v42, %v794_v17  ;;  %v835_v22 = vadd.f32 %v1675_v42, %v834_v19  ;;  %v716_v23 = vpop.f32.mrf.mxu0  ;;  %v756_v25 = vpop.f32.mrf.mxu1 }
 0x121   : > { %1061 = vst [vmem:[%s1684_s25 + $0xf0] sm:$0xff] %v997_v16  ;;  %v717_v27 = vadd.f32 %v1675_v42, %v716_v23  ;;  %v757_v28 = vadd.f32 %v1675_v42, %v756_v25 }
 0x122   : > { %v949_v29 = vadd.f32 %v885_v18, %v795_v21  ;;  %v965_v30 = vadd.f32 %v901_v20, %v835_v22 }
 0x123   : > { %v918_v31 = vadd.f32 %v854_v24, %v717_v27  ;;  %v934_v32 = vadd.f32 %v870_v26, %v757_v28 }
 0x124   : > { %v1013_v33 = vmax.f32 %v949_v29, 0.0  ;;  %v1029_v34 = vmax.f32 %v965_v30, 0.0 }
 0x125   : > { %v982_v35 = vmax.f32 %v918_v31, 0.0  ;;  %v998_v36 = vmax.f32 %v934_v32, 0.0 }
 0x126   : > { %1077 = vst [vmem:[%s1684_s25 + $0x170] sm:$0xff] %v1013_v33 }
 0x127   : > { %1093 = vst [vmem:[%s1684_s25 + $0x1f0] sm:$0xff] %v1029_v34  ;;  %v796_v37 = vpop.f32.mrf.mxu2  ;;  %v836_v39 = vpop.f32.mrf.mxu3 }
 0x128   : > { %1046 = vst [vmem:[%s1684_s25 + $0x78] sm:$0xff] %v982_v35  ;;  %v797_v41 = vadd.f32 %v1675_v42, %v796_v37  ;;  %v837_v43 = vadd.f32 %v1675_v42, %v836_v39 }
 0x129   : > { %1062 = vst [vmem:[%s1684_s25 + $0xf8] sm:$0xff] %v998_v36 }
 0x12a   : > { %v950_v44 = vadd.f32 %v886_v38, %v797_v41  ;;  %v966_v45 = vadd.f32 %v902_v40, %v837_v43 }
 0x12c   : > { %v1014_v46 = vmax.f32 %v950_v44, 0.0  ;;  %v1030_v47 = vmax.f32 %v966_v45, 0.0 }
 0x12e   : > { %1078 = vst [vmem:[%s1684_s25 + $0x178] sm:$0xff] %v1014_v46 }
 0x12f   : > { %1094 = vst [vmem:[%s1684_s25 + $0x1f8] sm:$0xff] %v1030_v47 }
 0x130 PF: > { %s14_s17 = sadd.s32 1, %s1522_s17   ;;  %s1888_s15 = smov %s1518_s16 }
 0x131   : > { %p11_p5 = scmp.ge.s32.totalorder %s14_s17, 4   ;;  %s1889_s16 = smov %s1891_s18 }
 0x133   :  { %13 = sbr.rel (!%p11_p5) target bundleno = 2 (0x2), region = 75 }

</bundles_post_ra>
